<compile_context>
chip_gen: v7x
topology: tpu7x:2x2x1
jax: 0.10.0
libtpu: 0.0.40
codegen_flags: <defaults>
</compile_context>

<pallas_src>
import functools

import jax
import jax.numpy as jnp
import numpy as np
from jax.experimental import pallas as pl
from jax.experimental.pallas import tpu as pltpu

# Sobel stencils (same constants as the PyTorch module); used only by the reference.
SOBEL_X = ((-1.0, 0.0, 1.0), (-2.0, 0.0, 2.0), (-1.0, 0.0, 1.0))
SOBEL_Y = ((1.0, 2.0, 1.0), (0.0, 0.0, 0.0), (-1.0, -2.0, -1.0))

ALPHA_CHANNEL = 3
ALIVE_THRESHOLD = 0.1


def gca_kernel(x_ref, w1x_ref, w1gx_ref, w1gy_ref, b1_ref, w2_ref,
               mask_ref, sel_ref, o_ref, *, n_channels):
    # x_ref / o_ref: (H, W*C) f32 in VMEM, packed NHWC for one batch element.
    C = n_channels
    H, WC = x_ref.shape
    x = x_ref[...]

    # Circular shifts on the packed layout (pure XLU rotates, no copies).
    def sh_h(y, oy):          # value at row (h + oy) mod H
        return pltpu.roll(y, (-oy) % H, axis=0)

    def sh_w(y, ox):          # value at pixel (w + ox) mod W (shift by ox*C lanes)
        return pltpu.roll(y, (-ox * C) % WC, axis=1)

    # ---- 1. perception: depthwise 3x3 Sobel, circular, separable form -----------
    sm_h = sh_h(x, -1) + 2.0 * x + sh_h(x, 1)          # [1,2,1] over rows
    grad_x = sh_w(sm_h, 1) - sh_w(sm_h, -1)            # [-1,0,1] over cols
    sm_w = sh_w(x, -1) + 2.0 * x + sh_w(x, 1)          # [1,2,1] over cols
    grad_y = sh_h(sm_w, -1) - sh_h(sm_w, 1)            # [1,0,-1] over rows

    # ---- 2. update MLP: 1x1 conv -> ReLU -> 1x1 conv as block-diag MXU matmuls ---
    h = (jnp.dot(x, w1x_ref[...], preferred_element_type=jnp.float32)
         + jnp.dot(grad_x, w1gx_ref[...], preferred_element_type=jnp.float32)
         + jnp.dot(grad_y, w1gy_ref[...], preferred_element_type=jnp.float32)
         + b1_ref[...])                                 # (H, W*HIDDEN)
    h = jnp.maximum(h, 0.0)
    ds = jnp.dot(h, w2_ref[...], preferred_element_type=jnp.float32)   # (H, W*C)

    # ---- 3./4. stochastic mask (pre-broadcast to packed layout) + new state ------
    raw = x + ds * mask_ref[...]

    # ---- 5. alive masking: 3x3 max-pool on alpha (lane offset 3), -inf borders ---
    lane = jax.lax.broadcasted_iota(jnp.int32, (H, WC), 1)
    row = jax.lax.broadcasted_iota(jnp.int32, (H, WC), 0)
    chan = (lane & (C - 1)) if (C & (C - 1)) == 0 else (lane % C)
    neg_inf = jnp.float32(-jnp.inf)

    alpha = jnp.where(chan == ALPHA_CHANNEL, raw, neg_inf)
    left = jnp.where(lane >= C, sh_w(alpha, -1), neg_inf)        # pixel w-1 (none at w=0)
    right = jnp.where(lane < WC - C, sh_w(alpha, 1), neg_inf)    # pixel w+1 (none at w=W-1)
    pooled_w = jnp.maximum(alpha, jnp.maximum(left, right))
    up = jnp.where(row >= 1, sh_h(pooled_w, -1), neg_inf)        # row h-1 (none at h=0)
    down = jnp.where(row < H - 1, sh_h(pooled_w, 1), neg_inf)    # row h+1 (none at h=H-1)
    pooled = jnp.maximum(pooled_w, jnp.maximum(up, down))

    alive = (pooled > ALIVE_THRESHOLD).astype(jnp.float32)       # 1.0 only at alpha lanes
    # Broadcast the per-pixel alive bit to all C lanes of that pixel via the MXU.
    alive_b = jnp.dot(alive, sel_ref[...], preferred_element_type=jnp.float32)

    o_ref[...] = (raw * alive_b).astype(o_ref.dtype)


def prepare_gca_params(w1, b1, w2, n_channels, width):
    """One-time packing of the 1x1-conv parameters into the lane-dense layout."""
    C, W = n_channels, width
    hidden = w1.shape[1]
    eye_w = jnp.eye(W, dtype=jnp.float32)
    # Per-pixel block-diagonal expansions so the pointwise MLP runs directly on the
    # packed (H, W*C) layout (no channel concat, no narrow-lane reshape in-kernel).
    w1x_bd = jnp.kron(eye_w, w1[:C])                 # (W*C, W*HIDDEN)
    w1gx_bd = jnp.kron(eye_w, w1[C:2 * C])
    w1gy_bd = jnp.kron(eye_w, w1[2 * C:])
    w2_bd = jnp.kron(eye_w, w2)                      # (W*HIDDEN, W*C)
    b1_tiled = jnp.tile(jnp.reshape(b1, (1, hidden)), (1, W))   # (1, W*HIDDEN)
    # Selector matrix: column (w*C + c) picks row (w*C + alpha) -> alive broadcast.
    idx = np.arange(W * C)
    sel = ((idx[:, None] // C == idx[None, :] // C)
           & (idx[:, None] % C == ALPHA_CHANNEL)).astype(np.float32)
    return w1x_bd, w1gx_bd, w1gy_bd, b1_tiled, w2_bd, jnp.asarray(sel)


def gca_step_packed(x_packed, params, rand_mask, n_channels):
    """One CA step on the packed (B, H, W*C) state."""
    B, H, WC = x_packed.shape
    C = n_channels
    w1x_bd, w1gx_bd, w1gy_bd, b1_tiled, w2_bd, sel = params
    WH = w1x_bd.shape[1]
    mask_packed = jnp.repeat(rand_mask, C, axis=1)   # (H, W*C), lane-dense

    kernel = functools.partial(gca_kernel, n_channels=C)
    return pl.pallas_call(
        kernel,
        grid=(B,),
        out_shape=jax.ShapeDtypeStruct((B, H, WC), jnp.float32),
        in_specs=[
            pl.BlockSpec((None, H, WC), lambda b: (b, 0, 0)),   # state (per batch)
            pl.BlockSpec((WC, WH), lambda b: (0, 0)),           # w1 (x part, block-diag)
            pl.BlockSpec((WC, WH), lambda b: (0, 0)),           # w1 (grad_x part)
            pl.BlockSpec((WC, WH), lambda b: (0, 0)),           # w1 (grad_y part)
            pl.BlockSpec((1, WH), lambda b: (0, 0)),            # bias, tiled per pixel
            pl.BlockSpec((WH, WC), lambda b: (0, 0)),           # w2 (block-diag)
            pl.BlockSpec((H, WC), lambda b: (0, 0)),            # stochastic mask
            pl.BlockSpec((WC, WC), lambda b: (0, 0)),           # alive-broadcast selector
        ],
        out_specs=pl.BlockSpec((None, H, WC), lambda b: (b, 0, 0)),
        compiler_params=pltpu.CompilerParams(
            dimension_semantics=("parallel",)),                 # 2 TCs on v7x
    )(x_packed, w1x_bd, w1gx_bd, w1gy_bd, b1_tiled, w2_bd, mask_packed, sel)


def gca_forward(x_nchw, w1, b1, w2, rand_mask):
    """NCHW boundary wrapper matching the PyTorch interface.

    For an iterated rollout, convert to the packed layout and build params once,
    then call gca_step_packed per step (avoids per-step NCHW<->packed relayouts).
    """
    B, C, H, W = x_nchw.shape
    x_packed = jnp.transpose(x_nchw, (0, 2, 3, 1)).reshape(B, H, W * C)
    params = prepare_gca_params(w1, b1, w2, C, W)
    out_packed = gca_step_packed(x_packed, params, rand_mask, C)
    return jnp.transpose(out_packed.reshape(B, H, W, C), (0, 3, 1, 2))


def _reference_nchw(x_nchw, w1, b1, w2, rand_mask):
    """Pure-JAX reference mirroring the PyTorch forward (for a sanity check)."""
    x = jnp.transpose(x_nchw, (0, 2, 3, 1))
    B, H, W, C = x.shape
    xp = jnp.pad(x, ((0, 0), (1, 1), (1, 1), (0, 0)), mode="wrap")
    gx = jnp.zeros_like(x)
    gy = jnp.zeros_like(x)
    for dy in range(3):
        for dx in range(3):
            win = xp[:, dy:dy + H, dx:dx + W, :]
            gx = gx + SOBEL_X[dy][dx] * win
            gy = gy + SOBEL_Y[dy][dx] * win
    perception = jnp.concatenate([x, gx, gy], axis=-1).reshape(B * H * W, 3 * C)
    h = jnp.maximum(perception @ w1 + b1.reshape(1, -1), 0.0)
    ds = (h @ w2).reshape(B, H, W, C)
    ds = ds * rand_mask[None, :, :, None]
    raw = x + ds
    alpha = raw[:, :, :, ALPHA_CHANNEL:ALPHA_CHANNEL + 1]
    ap = jnp.pad(alpha, ((0, 0), (1, 1), (1, 1), (0, 0)), constant_values=-jnp.inf)
    pooled = alpha
    for dy in range(3):
        for dx in range(3):
            pooled = jnp.maximum(pooled, ap[:, dy:dy + H, dx:dx + W, :])
    out = jnp.where(pooled > ALIVE_THRESHOLD, raw, 0.0)
    return jnp.transpose(out, (0, 3, 1, 2))


if __name__ == "__main__":
    # Small shapes consistent with the module: n_channels=8 (>=4 so the alpha channel
    # at index 3 exists, and W*C = 128 is lane-dense), hidden_channels=32, H == W == 16.
    B, C, H, W = 2, 8, 16, 16
    HIDDEN = 32

    key = jax.random.PRNGKey(0)
    kx, kw1, kb1, kw2, km = jax.random.split(key, 5)

    x = jax.random.uniform(kx, (B, C, H, W), jnp.float32)

    # Deterministic synthetic parameters: normal(0, 0.001), as in the module init,
    # stored in matmul convention (conv1: (3C, HIDDEN), conv2: (HIDDEN, C), no bias2).
    w1 = 0.001 * jax.random.normal(kw1, (3 * C, HIDDEN), jnp.float32)
    b1 = 0.001 * jax.random.normal(kb1, (HIDDEN,), jnp.float32)
    w2 = 0.001 * jax.random.normal(kw2, (HIDDEN, C), jnp.float32)

    # Stochastic update mask ((torch.rand(GRID,GRID) < 0.5).float()), generated in the
    # wrapper for determinism and passed in as data.
    # TODO(synk): could instead draw bits in-kernel with pltpu.prng_random_bits.
    rand_mask = (jax.random.uniform(km, (H, W)) < 0.5).astype(jnp.float32)

    out = jax.jit(gca_forward)(x, w1, b1, w2, rand_mask)
    out = jax.block_until_ready(out)

    ref = _reference_nchw(x, w1, b1, w2, rand_mask)
    assert out.shape == (B, C, H, W)
    np.testing.assert_allclose(np.asarray(out), np.asarray(ref), rtol=1e-3, atol=1e-5)

    print("KERNEL_OK")
</pallas_src>

<mosaic_0001>
module attributes {stable_mosaic.version = 11 : i64} {
  func.func @gca_kernel(%arg0: i32, %arg1: memref<1x16x128xf32, #tpu.memory_space<vmem>>, %arg2: memref<128x512xf32, #tpu.memory_space<vmem>>, %arg3: memref<128x512xf32, #tpu.memory_space<vmem>>, %arg4: memref<128x512xf32, #tpu.memory_space<vmem>>, %arg5: memref<1x512xf32, #tpu.memory_space<vmem>>, %arg6: memref<512x128xf32, #tpu.memory_space<vmem>>, %arg7: memref<16x128xf32, #tpu.memory_space<vmem>>, %arg8: memref<128x128xf32, #tpu.memory_space<vmem>>, %arg9: memref<1x16x128xf32, #tpu.memory_space<vmem>>) attributes {dimension_semantics = [#tpu.dimension_semantics<parallel>], iteration_bounds = array<i64: 2>, scalar_prefetch = 0 : i64, scratch_operands = 0 : i64, tpu.core_type = #tpu.core_type<tc>, window_params = [{transform_indices = @transform_0, window_bounds = array<i64: 1, 16, 128>}, {pipeline_mode = #tpu.pipeline_mode<synchronous>, transform_indices = @transform_1, window_bounds = array<i64: 128, 512>}, {pipeline_mode = #tpu.pipeline_mode<synchronous>, transform_indices = @transform_2, window_bounds = array<i64: 128, 512>}, {pipeline_mode = #tpu.pipeline_mode<synchronous>, transform_indices = @transform_3, window_bounds = array<i64: 128, 512>}, {pipeline_mode = #tpu.pipeline_mode<synchronous>, transform_indices = @transform_4, window_bounds = array<i64: 1, 512>}, {pipeline_mode = #tpu.pipeline_mode<synchronous>, transform_indices = @transform_5, window_bounds = array<i64: 512, 128>}, {pipeline_mode = #tpu.pipeline_mode<synchronous>, transform_indices = @transform_6, window_bounds = array<i64: 16, 128>}, {pipeline_mode = #tpu.pipeline_mode<synchronous>, transform_indices = @transform_7, window_bounds = array<i64: 128, 128>}, {transform_indices = @transform_8, window_bounds = array<i64: 1, 16, 128>}]} {
    %c0 = arith.constant 0 : index
    %c0_0 = arith.constant 0 : index
    %c0_1 = arith.constant 0 : index
    %0 = vector.load %arg1[%c0, %c0_0, %c0_1] : memref<1x16x128xf32, #tpu.memory_space<vmem>>, vector<1x16x128xf32>
    %1 = vector.shape_cast %0 : vector<1x16x128xf32> to vector<16x128xf32>
    %c1_i32 = arith.constant 1 : i32
    %2 = tpu.dynamic_rotate %1 by %c1_i32 dim 0 : vector<16x128xf32>, i32 -> vector<16x128xf32>
    %cst = arith.constant 2.000000e+00 : f32
    %3 = vector.broadcast %cst : f32 to vector<16x128xf32>
    %4 = arith.mulf %3, %1 : vector<16x128xf32>
    %5 = arith.addf %2, %4 : vector<16x128xf32>
    %c15_i32 = arith.constant 15 : i32
    %6 = tpu.dynamic_rotate %1 by %c15_i32 dim 0 : vector<16x128xf32>, i32 -> vector<16x128xf32>
    %7 = arith.addf %5, %6 : vector<16x128xf32>
    %c120_i32 = arith.constant 120 : i32
    %8 = tpu.dynamic_rotate %7 by %c120_i32 dim 1 : vector<16x128xf32>, i32 -> vector<16x128xf32>
    %c8_i32 = arith.constant 8 : i32
    %9 = tpu.dynamic_rotate %7 by %c8_i32 dim 1 : vector<16x128xf32>, i32 -> vector<16x128xf32>
    %10 = arith.subf %8, %9 : vector<16x128xf32>
    %c8_i32_2 = arith.constant 8 : i32
    %11 = tpu.dynamic_rotate %1 by %c8_i32_2 dim 1 : vector<16x128xf32>, i32 -> vector<16x128xf32>
    %cst_3 = arith.constant 2.000000e+00 : f32
    %12 = vector.broadcast %cst_3 : f32 to vector<16x128xf32>
    %13 = arith.mulf %12, %1 : vector<16x128xf32>
    %14 = arith.addf %11, %13 : vector<16x128xf32>
    %c120_i32_4 = arith.constant 120 : i32
    %15 = tpu.dynamic_rotate %1 by %c120_i32_4 dim 1 : vector<16x128xf32>, i32 -> vector<16x128xf32>
    %16 = arith.addf %14, %15 : vector<16x128xf32>
    %c1_i32_5 = arith.constant 1 : i32
    %17 = tpu.dynamic_rotate %16 by %c1_i32_5 dim 0 : vector<16x128xf32>, i32 -> vector<16x128xf32>
    %c15_i32_6 = arith.constant 15 : i32
    %18 = tpu.dynamic_rotate %16 by %c15_i32_6 dim 0 : vector<16x128xf32>, i32 -> vector<16x128xf32>
    %19 = arith.subf %17, %18 : vector<16x128xf32>
    %c0_7 = arith.constant 0 : index
    %c0_8 = arith.constant 0 : index
    %20 = vector.load %arg2[%c0_7, %c0_8] : memref<128x512xf32, #tpu.memory_space<vmem>>, vector<128x512xf32>
    %cst_9 = arith.constant dense<0.000000e+00> : vector<16x512xf32>
    %21 = tpu.matmul %1, %20, %cst_9 {dimension_numbers = #tpu.dot_dimension_numbers<[1], [0], [0], [1], [0, 0, 1, 1], [], []>} : vector<16x128xf32>, vector<128x512xf32>, vector<16x512xf32> -> vector<16x512xf32>
    %c0_10 = arith.constant 0 : index
    %c0_11 = arith.constant 0 : index
    %22 = vector.load %arg3[%c0_10, %c0_11] : memref<128x512xf32, #tpu.memory_space<vmem>>, vector<128x512xf32>
    %cst_12 = arith.constant dense<0.000000e+00> : vector<16x512xf32>
    %23 = tpu.matmul %10, %22, %cst_12 {dimension_numbers = #tpu.dot_dimension_numbers<[1], [0], [0], [1], [0, 0, 1, 1], [], []>} : vector<16x128xf32>, vector<128x512xf32>, vector<16x512xf32> -> vector<16x512xf32>
    %24 = arith.addf %21, %23 : vector<16x512xf32>
    %c0_13 = arith.constant 0 : index
    %c0_14 = arith.constant 0 : index
    %25 = vector.load %arg4[%c0_13, %c0_14] : memref<128x512xf32, #tpu.memory_space<vmem>>, vector<128x512xf32>
    %cst_15 = arith.constant dense<0.000000e+00> : vector<16x512xf32>
    %26 = tpu.matmul %19, %25, %cst_15 {dimension_numbers = #tpu.dot_dimension_numbers<[1], [0], [0], [1], [0, 0, 1, 1], [], []>} : vector<16x128xf32>, vector<128x512xf32>, vector<16x512xf32> -> vector<16x512xf32>
    %27 = arith.addf %24, %26 : vector<16x512xf32>
    %c0_16 = arith.constant 0 : index
    %c0_17 = arith.constant 0 : index
    %28 = vector.load %arg5[%c0_16, %c0_17] : memref<1x512xf32, #tpu.memory_space<vmem>>, vector<1x512xf32>
    %29 = vector.broadcast %28 : vector<1x512xf32> to vector<16x512xf32>
    %30 = arith.addf %27, %29 : vector<16x512xf32>
    %cst_18 = arith.constant 0.000000e+00 : f32
    %31 = vector.broadcast %cst_18 : f32 to vector<16x512xf32>
    %32 = arith.maximumf %30, %31 : vector<16x512xf32>
    %c0_19 = arith.constant 0 : index
    %c0_20 = arith.constant 0 : index
    %33 = vector.load %arg6[%c0_19, %c0_20] : memref<512x128xf32, #tpu.memory_space<vmem>>, vector<512x128xf32>
    %cst_21 = arith.constant dense<0.000000e+00> : vector<16x128xf32>
    %34 = tpu.matmul %32, %33, %cst_21 {dimension_numbers = #tpu.dot_dimension_numbers<[1], [0], [0], [1], [0, 0, 1, 1], [], []>} : vector<16x512xf32>, vector<512x128xf32>, vector<16x128xf32> -> vector<16x128xf32>
    %c0_22 = arith.constant 0 : index
    %c0_23 = arith.constant 0 : index
    %35 = vector.load %arg7[%c0_22, %c0_23] : memref<16x128xf32, #tpu.memory_space<vmem>>, vector<16x128xf32>
    %36 = arith.mulf %34, %35 : vector<16x128xf32>
    %37 = arith.addf %1, %36 : vector<16x128xf32>
    %38 = tpu.iota {dimensions = array<i32: 1>} : vector<16x128xi32>
    %39 = tpu.iota {dimensions = array<i32: 0>} : vector<16x128xi32>
    %c7_i32 = arith.constant 7 : i32
    %40 = vector.broadcast %c7_i32 : i32 to vector<16x128xi32>
    %41 = arith.andi %38, %40 : vector<16x128xi32>
    %c3_i32 = arith.constant 3 : i32
    %42 = vector.broadcast %c3_i32 : i32 to vector<16x128xi32>
    %43 = arith.cmpi eq, %41, %42 : vector<16x128xi32>
    %cst_24 = arith.constant 0xFF800000 : f32
    %44 = vector.broadcast %cst_24 : f32 to vector<16x128xf32>
    %45 = arith.select %43, %37, %44 : vector<16x128xi1>, vector<16x128xf32>
    %c8_i32_25 = arith.constant 8 : i32
    %46 = vector.broadcast %c8_i32_25 : i32 to vector<16x128xi32>
    %47 = arith.cmpi sge, %38, %46 : vector<16x128xi32>
    %c8_i32_26 = arith.constant 8 : i32
    %48 = tpu.dynamic_rotate %45 by %c8_i32_26 dim 1 : vector<16x128xf32>, i32 -> vector<16x128xf32>
    %cst_27 = arith.constant 0xFF800000 : f32
    %49 = vector.broadcast %cst_27 : f32 to vector<16x128xf32>
    %50 = arith.select %47, %48, %49 : vector<16x128xi1>, vector<16x128xf32>
    %c120_i32_28 = arith.constant 120 : i32
    %51 = vector.broadcast %c120_i32_28 : i32 to vector<16x128xi32>
    %52 = arith.cmpi slt, %38, %51 : vector<16x128xi32>
    %c120_i32_29 = arith.constant 120 : i32
    %53 = tpu.dynamic_rotate %45 by %c120_i32_29 dim 1 : vector<16x128xf32>, i32 -> vector<16x128xf32>
    %cst_30 = arith.constant 0xFF800000 : f32
    %54 = vector.broadcast %cst_30 : f32 to vector<16x128xf32>
    %55 = arith.select %52, %53, %54 : vector<16x128xi1>, vector<16x128xf32>
    %56 = arith.maximumf %50, %55 : vector<16x128xf32>
    %57 = arith.maximumf %45, %56 : vector<16x128xf32>
    %c1_i32_31 = arith.constant 1 : i32
    %58 = vector.broadcast %c1_i32_31 : i32 to vector<16x128xi32>
    %59 = arith.cmpi sge, %39, %58 : vector<16x128xi32>
    %c1_i32_32 = arith.constant 1 : i32
    %60 = tpu.dynamic_rotate %57 by %c1_i32_32 dim 0 : vector<16x128xf32>, i32 -> vector<16x128xf32>
    %cst_33 = arith.constant 0xFF800000 : f32
    %61 = vector.broadcast %cst_33 : f32 to vector<16x128xf32>
    %62 = arith.select %59, %60, %61 : vector<16x128xi1>, vector<16x128xf32>
    %c15_i32_34 = arith.constant 15 : i32
    %63 = vector.broadcast %c15_i32_34 : i32 to vector<16x128xi32>
    %64 = arith.cmpi slt, %39, %63 : vector<16x128xi32>
    %c15_i32_35 = arith.constant 15 : i32
    %65 = tpu.dynamic_rotate %57 by %c15_i32_35 dim 0 : vector<16x128xf32>, i32 -> vector<16x128xf32>
    %cst_36 = arith.constant 0xFF800000 : f32
    %66 = vector.broadcast %cst_36 : f32 to vector<16x128xf32>
    %67 = arith.select %64, %65, %66 : vector<16x128xi1>, vector<16x128xf32>
    %68 = arith.maximumf %62, %67 : vector<16x128xf32>
    %69 = arith.maximumf %57, %68 : vector<16x128xf32>
    %cst_37 = arith.constant 1.000000e-01 : f32
    %70 = vector.broadcast %cst_37 : f32 to vector<16x128xf32>
    %71 = arith.cmpf ogt, %69, %70 : vector<16x128xf32>
    %72 = arith.extui %71 : vector<16x128xi1> to vector<16x128xi32>
    %73 = arith.sitofp %72 : vector<16x128xi32> to vector<16x128xf32>
    %c0_38 = arith.constant 0 : index
    %c0_39 = arith.constant 0 : index
    %74 = vector.load %arg8[%c0_38, %c0_39] : memref<128x128xf32, #tpu.memory_space<vmem>>, vector<128x128xf32>
    %cst_40 = arith.constant dense<0.000000e+00> : vector<16x128xf32>
    %75 = tpu.matmul %73, %74, %cst_40 {dimension_numbers = #tpu.dot_dimension_numbers<[1], [0], [0], [1], [0, 0, 1, 1], [], []>} : vector<16x128xf32>, vector<128x128xf32>, vector<16x128xf32> -> vector<16x128xf32>
    %76 = arith.mulf %37, %75 : vector<16x128xf32>
    %c0_41 = arith.constant 0 : index
    %c0_42 = arith.constant 0 : index
    %c0_43 = arith.constant 0 : index
    %77 = vector.load %arg9[%c0_41, %c0_42, %c0_43] : memref<1x16x128xf32, #tpu.memory_space<vmem>>, vector<1x16x128xf32>
    %78 = vector.shape_cast %77 : vector<1x16x128xf32> to vector<16x128xf32>
    %79 = vector.shape_cast %76 : vector<16x128xf32> to vector<1x16x128xf32>
    tpu.vector_store %arg9[%c0_41, %c0_42, %c0_43], %79 {strides = array<i32>} : memref<1x16x128xf32, #tpu.memory_space<vmem>>, vector<1x16x128xf32>,
    return
  }
  func.func @transform_0(%arg0: i32) -> (i32, i32, i32) {
    %c0_i32 = arith.constant 0 : i32
    %c0_i32_0 = arith.constant 0 : i32
    %c0_i32_1 = arith.constant 0 : i32
    return %arg0, %c0_i32, %c0_i32_0 : i32, i32, i32
  }
  func.func @transform_1(%arg0: i32) -> (i32, i32) {
    %c0_i32 = arith.constant 0 : i32
    %c0_i32_0 = arith.constant 0 : i32
    %c0_i32_1 = arith.constant 0 : i32
    return %c0_i32, %c0_i32_0 : i32, i32
  }
  func.func @transform_2(%arg0: i32) -> (i32, i32) {
    %c0_i32 = arith.constant 0 : i32
    %c0_i32_0 = arith.constant 0 : i32
    %c0_i32_1 = arith.constant 0 : i32
    return %c0_i32, %c0_i32_0 : i32, i32
  }
  func.func @transform_3(%arg0: i32) -> (i32, i32) {
    %c0_i32 = arith.constant 0 : i32
    %c0_i32_0 = arith.constant 0 : i32
    %c0_i32_1 = arith.constant 0 : i32
    return %c0_i32, %c0_i32_0 : i32, i32
  }
  func.func @transform_4(%arg0: i32) -> (i32, i32) {
    %c0_i32 = arith.constant 0 : i32
    %c0_i32_0 = arith.constant 0 : i32
    %c0_i32_1 = arith.constant 0 : i32
    return %c0_i32, %c0_i32_0 : i32, i32
  }
  func.func @transform_5(%arg0: i32) -> (i32, i32) {
    %c0_i32 = arith.constant 0 : i32
    %c0_i32_0 = arith.constant 0 : i32
    %c0_i32_1 = arith.constant 0 : i32
    return %c0_i32, %c0_i32_0 : i32, i32
  }
  func.func @transform_6(%arg0: i32) -> (i32, i32) {
    %c0_i32 = arith.constant 0 : i32
    %c0_i32_0 = arith.constant 0 : i32
    %c0_i32_1 = arith.constant 0 : i32
    return %c0_i32, %c0_i32_0 : i32, i32
  }
  func.func @transform_7(%arg0: i32) -> (i32, i32) {
    %c0_i32 = arith.constant 0 : i32
    %c0_i32_0 = arith.constant 0 : i32
    %c0_i32_1 = arith.constant 0 : i32
    return %c0_i32, %c0_i32_0 : i32, i32
  }
  func.func @transform_8(%arg0: i32) -> (i32, i32, i32) {
    %c0_i32 = arith.constant 0 : i32
    %c0_i32_0 = arith.constant 0 : i32
    %c0_i32_1 = arith.constant 0 : i32
    return %arg0, %c0_i32, %c0_i32_0 : i32, i32, i32
  }
}

</mosaic_0001>

<bundles_post_ra>
// kernel: gca_forward.1
= control target key start
LH: loop header
LB: loop body
LE: loop exit
PB: predicated region body
PF: predicated region fallthrough
CT: control target
= control target key end

     0   :  { %s2000_s27 = smov 0   ;;  %s2954_s0 = inlined_call_operand.vmem [shape: f32[2,16,128], index: 0, kind: input, shape index: {}]   ;;  %s2955_s1 = inlined_call_operand.vmem [shape: f32[128,512], index: 1, kind: input, shape index: {}]   ;;  %s2956_s2 = inlined_call_operand.vmem [shape: f32[128,512], index: 2, kind: input, shape index: {}]   ;;  %s2957_s3 = inlined_call_operand.vmem [shape: f32[128,512], index: 3, kind: input, shape index: {}]   ;;  %s2958_s4 = inlined_call_operand.vmem [shape: f32[1,512], index: 4, kind: input, shape index: {}]   ;;  %s2959_s5 = inlined_call_operand.vmem [shape: f32[512,128], index: 5, kind: input, shape index: {}]   ;;  %s2960_s6 = inlined_call_operand.vmem [shape: f32[16,128], index: 6, kind: input, shape index: {}]   ;;  %s2961_s7 = inlined_call_operand.vmem [shape: f32[128,128], index: 7, kind: input, shape index: {}]   ;;  %s2962_s8 = inlined_call_operand.vmem [shape: f32[2,16,128], index: 8, kind: output, shape index: {}]  }
   0x1 LB: > { %s1479_s28 = sadd.s32 4294967295, %s1949_s27   ;;  %p1483_p0 = scmp.ge.s32.totalorder %s1949_s27, 1  ;;  %s1949_s27 = sphi %s2000_s27, %s18_s27  }
   0x2   : > { %p262_p1 = scmp.lt.s32.totalorder %s1949_s27, 3 }
   0x4   : > { %p263_p2 = pnand %p1483_p0, %p262_p1 }
   0x5   : > { %p296_p3 = scmp.lt.s32.totalorder (!%p263_p2), %s1479_s28, 1  ;;  %v310_v0 = vlaneseq (!%p263_p2)  ;;  %v423_v1 = vld [vmem:[%s2956_s2 + $0x8] sm:$0xff] (!%p263_p2)  ;;  %v425_v3 = vld [vmem:[%s2956_s2 + $0x18] sm:$0xff] (!%p263_p2)  ;;  %v422_v6 = vld [vmem:[%s2956_s2] sm:$0xff] (!%p263_p2)  ;;  %v1951_v38 = vmov (!%p263_p2), 0.0   ;;  %s1952_s14 = smov (!%p263_p2), 120  }
   0x6   : > { %266 = sbr.rel (%p263_p2) target bundleno = 1003 (0x3eb), region = 52  ;;  %v427_v2 = vld [vmem:[%s2956_s2 + $0x28] sm:$0xff] (!%p263_p2)  ;;  %v429_v5 = vld [vmem:[%s2956_s2 + $0x38] sm:$0xff] (!%p263_p2)  ;;  %v426_v7 = vld [vmem:[%s2956_s2 + $0x20] sm:$0xff] (!%p263_p2)  ;;  %550 = vmatprep.mubr.f32.mxu0 (!%p263_p2), %v1951_v38  ;;  %627 = vmatprep.mubr.f32.mxu1 (!%p263_p2), %v1951_v38  ;;  %s1953_s16 = smov (!%p263_p2), 8  }
   0x7   : > { %v1625_v4 = vpack.c.bf16 (!%p263_p2), %v427_v2, %v423_v1  ;;  %v2029_v8 = vshrl.u32 (!%p263_p2), %v310_v0, 7  ;;  %v1657_v9 = vpack.c.bf16 (!%p263_p2), %v429_v5, %v425_v3  ;;  %v1627_v10 = vpack.c.bf16 (!%p263_p2), %v426_v7, %v422_v6  ;;  %v424_v11 = vld [vmem:[%s2956_s2 + $0x10] sm:$0xff] (!%p263_p2)  ;;  %v431_v13 = vld [vmem:[%s2956_s2 + $0x48] sm:$0xff] (!%p263_p2)  ;;  %v433_v16 = vld [vmem:[%s2956_s2 + $0x58] sm:$0xff] (!%p263_p2) }
   0x8   : > { %v428_v12 = vld [vmem:[%s2956_s2 + $0x30] sm:$0xff] (!%p263_p2)  ;;  %v435_v15 = vld [vmem:[%s2956_s2 + $0x68] sm:$0xff] (!%p263_p2)  ;;  %v437_v17 = vld [vmem:[%s2956_s2 + $0x78] sm:$0xff] (!%p263_p2) }
   0x9   : > { %1626 = vmatprep.subr.bf16.mxu0 (!%p263_p2), %v1625_v4  ;;  %v1659_v14 = vpack.c.bf16 (!%p263_p2), %v428_v12, %v424_v11  ;;  %1658 = vmatprep.subr.bf16.mxu1 (!%p263_p2), %v1657_v9  ;;  %v1629_v18 = vpack.c.bf16 (!%p263_p2), %v435_v15, %v431_v13  ;;  %v1661_v19 = vpack.c.bf16 (!%p263_p2), %v437_v17, %v433_v16  ;;  %v430_v20 = vld [vmem:[%s2956_s2 + $0x40] sm:$0xff] (!%p263_p2)  ;;  %v432_v22 = vld [vmem:[%s2956_s2 + $0x50] sm:$0xff] (!%p263_p2)  ;;  %v439_v25 = vld [vmem:[%s2956_s2 + $0x88] sm:$0xff] (!%p263_p2)  ;;  %vm312_vm0 = vcmp.lt.s32.totalorder (!%p263_p2), %v2029_v8, 1 }
   0xa   : > { %1628 = vmatpush1.bf16.msra.mxu0 (!%p263_p2), %v1627_v10  ;;  %v434_v21 = vld [vmem:[%s2956_s2 + $0x60] sm:$0xff] (!%p263_p2)  ;;  %v436_v24 = vld [vmem:[%s2956_s2 + $0x70] sm:$0xff] (!%p263_p2)  ;;  %v443_v26 = vld [vmem:[%s2956_s2 + $0xa8] sm:$0xff] (!%p263_p2)  ;;  %vm321_vm1 = vcmp.lt.s32.totalorder (!%p263_p2), %v2029_v8, 7  ;;  %vm1303_vm6 = vcmp.ge.s32.totalorder (!%p263_p2), %v2029_v8, 1 }
   0xb   : > { %1660 = vmatpush1.bf16.msra.mxu1 (!%p263_p2), %v1659_v14  ;;  %v1631_v23 = vpack.c.bf16 (!%p263_p2), %v434_v21, %v430_v20  ;;  %1630 = vmatprep.subr.bf16.mxu0 (!%p263_p2), %v1629_v18  ;;  %v1663_v29 = vpack.c.bf16 (!%p263_p2), %v436_v24, %v432_v22  ;;  %v1633_v30 = vpack.c.bf16 (!%p263_p2), %v443_v26, %v439_v25  ;;  %v441_v31 = vld [vmem:[%s2956_s2 + $0x98] sm:$0xff] (!%p263_p2)  ;;  %v438_v37 = vld [vmem:[%s2956_s2 + $0x80] sm:$0xff] (!%p263_p2)  ;;  %v440_v43 = vld [vmem:[%s2956_s2 + $0x90] sm:$0xff] (!%p263_p2) }
   0xc   : > { %1662 = vmatprep.subr.bf16.mxu1 (!%p263_p2), %v1661_v19  ;;  %v445_v36 = vld [vmem:[%s2956_s2 + $0xb8] sm:$0xff] (!%p263_p2)  ;;  %v442_v42 = vld [vmem:[%s2956_s2 + $0xa0] sm:$0xff] (!%p263_p2)  ;;  %v444_v44 = vld [vmem:[%s2956_s2 + $0xb0] sm:$0xff] (!%p263_p2) }
   0xd   : > { %s2966_s28 = smov (!%p296_p3, %s1479_s28), 1  ;;  %v1665_v41 = vpack.c.bf16 %v445_v36, %v441_v31  ;;  %v1635_v47 = vpack.c.bf16 %v442_v42, %v438_v37  ;;  %v447_v48 = vld [vmem:[%s2956_s2 + $0xc8] sm:$0xff]  ;;  %v449_v50 = vld [vmem:[%s2956_s2 + $0xd8] sm:$0xff]  ;;  %v446_v56 = vld [vmem:[%s2956_s2 + $0xc0] sm:$0xff]  ;;  %v1667_v58 = vpack.c.bf16 %v444_v44, %v440_v43 }
   0xe   : > { %s1494_s11 = sshll.u32 %s2966_s28, 4  ;;  %1632 = vmatpush1.bf16.msra.mxu0 %v1631_v23  ;;  %v451_v49 = vld [vmem:[%s2956_s2 + $0xe8] sm:$0xff]  ;;  %v453_v55 = vld [vmem:[%s2956_s2 + $0xf8] sm:$0xff]  ;;  %v450_v57 = vld [vmem:[%s2956_s2 + $0xe0] sm:$0xff] }
   0xf   : > { %s2064_s20 = scalar_lea.vmem %s2954_s0, %s1494_s11  ;;  %1664 = vmatpush1.bf16.msra.mxu1 %v1663_v29  ;;  %1634 = vmatprep.subr.bf16.mxu0 %v1633_v30  ;;  %v1637_v59 = vpack.c.bf16 %v451_v49, %v447_v48  ;;  %v1669_v60 = vpack.c.bf16 %v453_v55, %v449_v50  ;;  %v448_v61 = vld [vmem:[%s2956_s2 + $0xd0] sm:$0xff]  ;;  %v455_v63 = vld [vmem:[%s2956_s2 + $0x108] sm:$0xff]  ;;  %v1639_v3 = vpack.c.bf16 %v450_v57, %v446_v56  ;;  %v457_v5 = vld [vmem:[%s2956_s2 + $0x118] sm:$0xff] }
  0x10   : > { %v2076_v27 = vld [vmem:[%s2064_s20] sm:$0xff]  ;;  %v2079_v28 = vld [vmem:[%s2064_s20 + $0x8] sm:$0xff]  ;;  %1666 = vmatprep.subr.bf16.mxu1 %v1665_v41  ;;  %v452_v62 = vld [vmem:[%s2956_s2 + $0xf0] sm:$0xff] }
  0x11   : > { %v308_v32 = vrot.slane %v2076_v27, 7  ;;  %v309_v33 = vrot.slane %v2079_v28, 7  ;;  %v2089_v34 = vmul.f32 2.0, %v2076_v27  ;;  %v319_v35 = vrot.slane %v2076_v27, 1  ;;  %v459_v4 = vld [vmem:[%s2956_s2 + $0x128] sm:$0xff]  ;;  %v461_v6 = vld [vmem:[%s2956_s2 + $0x138] sm:$0xff] }
  0x12   : > { %v320_v39 = vrot.slane %v2079_v28, 1  ;;  %v2102_v40 = vmul.f32 2.0, %v2079_v28  ;;  %1636 = vmatpush1.bf16.msra.mxu0 %v1635_v47  ;;  %v1671_v7 = vpack.c.bf16 %v452_v62, %v448_v61  ;;  %v1641_v9 = vpack.c.bf16 %v459_v4, %v455_v63  ;;  %v454_v10 = vld [vmem:[%s2956_s2 + $0x100] sm:$0xff]  ;;  %v456_v12 = vld [vmem:[%s2956_s2 + $0x110] sm:$0xff]  ;;  %v463_v14 = vld [vmem:[%s2956_s2 + $0x148] sm:$0xff] }
  0x13   : > { %v314_v45 = vsel %vm312_vm0, %v309_v33, %v308_v32  ;;  %v313_v46 = vsel %vm312_vm0, %v308_v32, %v309_v33  ;;  %1668 = vmatpush1.bf16.msra.mxu1 %v1667_v58  ;;  %1638 = vmatprep.subr.bf16.mxu0 %v1637_v59  ;;  %v458_v11 = vld [vmem:[%s2956_s2 + $0x120] sm:$0xff]  ;;  %v460_v13 = vld [vmem:[%s2956_s2 + $0x130] sm:$0xff]  ;;  %v1673_v15 = vpack.c.bf16 %v461_v6, %v457_v5  ;;  %v467_v16 = vld [vmem:[%s2956_s2 + $0x168] sm:$0xff] }
  0x14   : > { %v317_v51 = vadd.f32 %v2089_v34, %v314_v45  ;;  %v322_v52 = vsel %vm321_vm1, %v319_v35, %v320_v39  ;;  %v318_v53 = vadd.f32 %v2102_v40, %v313_v46  ;;  %v323_v54 = vsel %vm321_vm1, %v320_v39, %v319_v35  ;;  %1670 = vmatprep.subr.bf16.mxu1 %v1669_v60  ;;  %v465_v18 = vld [vmem:[%s2956_s2 + $0x158] sm:$0xff]  ;;  %v462_v20 = vld [vmem:[%s2956_s2 + $0x140] sm:$0xff]  ;;  %v464_v24 = vld [vmem:[%s2956_s2 + $0x150] sm:$0xff] }
  0x15   : > { %v1643_v17 = vpack.c.bf16 %v458_v11, %v454_v10  ;;  %v469_v19 = vld [vmem:[%s2956_s2 + $0x178] sm:$0xff]  ;;  %v1675_v21 = vpack.c.bf16 %v460_v13, %v456_v12  ;;  %v1645_v22 = vpack.c.bf16 %v467_v16, %v463_v14  ;;  %v466_v23 = vld [vmem:[%s2956_s2 + $0x160] sm:$0xff]  ;;  %v468_v25 = vld [vmem:[%s2956_s2 + $0x170] sm:$0xff] }
  0x16   : > { %v324_v1 = vadd.f32 %v322_v52, %v317_v51  ;;  %v325_v2 = vadd.f32 %v323_v54, %v318_v53  ;;  %1640 = vmatpush1.bf16.msra.mxu0 %v1639_v3  ;;  %v471_v26 = vld [vmem:[%s2956_s2 + $0x188] sm:$0xff]  ;;  %v1677_v30 = vpack.c.bf16 %v469_v19, %v465_v18  ;;  %v1647_v31 = vpack.c.bf16 %v466_v23, %v462_v20  ;;  %v473_v32 = vld [vmem:[%s2956_s2 + $0x198] sm:$0xff]  ;;  %v470_v35 = vld [vmem:[%s2956_s2 + $0x180] sm:$0xff] }
  0x17   : > { %1672 = vmatpush1.bf16.msra.mxu1 %v1671_v7  ;;  %1642 = vmatprep.subr.bf16.mxu0 %v1641_v9  ;;  %v475_v29 = vld [vmem:[%s2956_s2 + $0x1a8] sm:$0xff]  ;;  %v477_v33 = vld [vmem:[%s2956_s2 + $0x1b8] sm:$0xff]  ;;  %v1679_v36 = vpack.c.bf16 %v468_v25, %v464_v24  ;;  %v474_v39 = vld [vmem:[%s2956_s2 + $0x1a0] sm:$0xff] }
  0x18   : > { %326 = vrot.lane.b32.xlu0 %v324_v1, %s1952_s14  ;;  %328 = vrot.lane.b32.xlu1 %v325_v2, %s1952_s14  ;;  %v1649_v37 = vpack.c.bf16 %v475_v29, %v471_v26  ;;  %v472_v41 = vld [vmem:[%s2956_s2 + $0x190] sm:$0xff]  ;;  %v479_v43 = vld [vmem:[%s2956_s2 + $0x1c8] sm:$0xff]  ;;  %v1681_v45 = vpack.c.bf16 %v477_v33, %v473_v32  ;;  %v1651_v48 = vpack.c.bf16 %v474_v39, %v470_v35 }
  0x19   : > { %1674 = vmatprep.subr.bf16.mxu1 %v1673_v15  ;;  %v476_v42 = vld [vmem:[%s2956_s2 + $0x1b0] sm:$0xff]  ;;  %v483_v44 = vld [vmem:[%s2956_s2 + $0x1e8] sm:$0xff]  ;;  %v481_v46 = vld [vmem:[%s2956_s2 + $0x1d8] sm:$0xff] }
  0x1a   : > { %1644 = vmatpush1.bf16.msra.mxu0 %v1643_v17  ;;  %v485_v47 = vld [vmem:[%s2956_s2 + $0x1f8] sm:$0xff]  ;;  %v478_v49 = vld [vmem:[%s2956_s2 + $0x1c0] sm:$0xff]  ;;  %v1683_v50 = vpack.c.bf16 %v476_v42, %v472_v41  ;;  %v1653_v51 = vpack.c.bf16 %v483_v44, %v479_v43  ;;  %v480_v53 = vld [vmem:[%s2956_s2 + $0x1d0] sm:$0xff] }
  0x1b   : > { %1676 = vmatpush1.bf16.msra.mxu1 %v1675_v21  ;;  %1646 = vmatprep.subr.bf16.mxu0 %v1645_v22  ;;  %v482_v52 = vld [vmem:[%s2956_s2 + $0x1e0] sm:$0xff]  ;;  %v484_v54 = vld [vmem:[%s2956_s2 + $0x1f0] sm:$0xff]  ;;  %v1685_v55 = vpack.c.bf16 %v485_v47, %v481_v46  ;;  %v359_v56 = vld [vmem:[%s2955_s1 + $0x8] sm:$0xff] }
  0x1c   : > { %330 = vrot.lane.b32.xlu0 %v324_v1, %s1953_s16  ;;  %332 = vrot.lane.b32.xlu1 %v325_v2, %s1953_s16  ;;  %v363_v57 = vld [vmem:[%s2955_s1 + $0x28] sm:$0xff]  ;;  %v361_v58 = vld [vmem:[%s2955_s1 + $0x18] sm:$0xff]  ;;  %v1655_v60 = vpack.c.bf16 %v482_v52, %v478_v49  ;;  %v1687_v61 = vpack.c.bf16 %v484_v54, %v480_v53 }
  0x1d   : > { %1678 = vmatprep.subr.bf16.mxu1 %v1677_v30  ;;  %v365_v59 = vld [vmem:[%s2955_s1 + $0x38] sm:$0xff]  ;;  %v1689_v62 = vpack.c.bf16 %v363_v57, %v359_v56  ;;  %v358_v2 = vld [vmem:[%s2955_s1] sm:$0xff]  ;;  %v360_v5 = vld [vmem:[%s2955_s1 + $0x10] sm:$0xff] }
  0x1e   : > { %1648 = vmatpush1.bf16.msra.mxu0 %v1647_v31  ;;  %v1721_v63 = vpack.c.bf16 %v365_v59, %v361_v58  ;;  %v362_v3 = vld [vmem:[%s2955_s1 + $0x20] sm:$0xff]  ;;  %v364_v6 = vld [vmem:[%s2955_s1 + $0x30] sm:$0xff]  ;;  %v367_v7 = vld [vmem:[%s2955_s1 + $0x48] sm:$0xff] }
  0x1f   : > { %1680 = vmatpush1.bf16.msra.mxu1 %v1679_v36  ;;  %1650 = vmatprep.subr.bf16.mxu0 %v1649_v37  ;;  %v371_v9 = vld [vmem:[%s2955_s1 + $0x68] sm:$0xff]  ;;  %v369_v10 = vld [vmem:[%s2955_s1 + $0x58] sm:$0xff]  ;;  %v1691_v13 = vpack.c.bf16 %v362_v3, %v358_v2  ;;  %v1723_v14 = vpack.c.bf16 %v364_v6, %v360_v5  ;;  %v366_v15 = vld [vmem:[%s2955_s1 + $0x40] sm:$0xff] }
  0x20   : > { %336 = vrot.lane.b32.xlu0 %v2076_v27, %s1953_s16  ;;  %338 = vrot.lane.b32.xlu1 %v2079_v28, %s1953_s16  ;;  %v373_v11 = vld [vmem:[%s2955_s1 + $0x78] sm:$0xff]  ;;  %v370_v16 = vld [vmem:[%s2955_s1 + $0x60] sm:$0xff]  ;;  %v1693_v19 = vpack.c.bf16 %v371_v9, %v367_v7 }
  0x21   : > { %1682 = vmatprep.subr.bf16.mxu1 %v1681_v45  ;;  %v1725_v20 = vpack.c.bf16 %v373_v11, %v369_v10  ;;  %v368_v21 = vld [vmem:[%s2955_s1 + $0x50] sm:$0xff]  ;;  %v375_v23 = vld [vmem:[%s2955_s1 + $0x88] sm:$0xff]  ;;  %v377_v25 = vld [vmem:[%s2955_s1 + $0x98] sm:$0xff]  ;;  %v1695_v30 = vpack.c.bf16 %v370_v16, %v366_v15 }
  0x22   : > { %1652 = vmatpush1.bf16.msra.mxu0 %v1651_v48  ;;  %v372_v22 = vld [vmem:[%s2955_s1 + $0x70] sm:$0xff]  ;;  %v379_v24 = vld [vmem:[%s2955_s1 + $0xa8] sm:$0xff]  ;;  %v381_v26 = vld [vmem:[%s2955_s1 + $0xb8] sm:$0xff] }
  0x23   : > { %1684 = vmatpush1.bf16.msra.mxu1 %v1683_v50  ;;  %1654 = vmatprep.subr.bf16.mxu0 %v1653_v51  ;;  %v1727_v31 = vpack.c.bf16 %v372_v22, %v368_v21  ;;  %v374_v32 = vld [vmem:[%s2955_s1 + $0x80] sm:$0xff]  ;;  %v1697_v35 = vpack.c.bf16 %v379_v24, %v375_v23  ;;  %v1729_v36 = vpack.c.bf16 %v381_v26, %v377_v25  ;;  %v376_v37 = vld [vmem:[%s2955_s1 + $0x90] sm:$0xff]  ;;  %v383_v41 = vld [vmem:[%s2955_s1 + $0xc8] sm:$0xff] }
  0x24   : > { %342 = vrot.lane.b32.xlu0 %v2076_v27, %s1952_s14  ;;  %344 = vrot.lane.b32.xlu1 %v2079_v28, %s1952_s14  ;;  %v378_v33 = vld [vmem:[%s2955_s1 + $0xa0] sm:$0xff]  ;;  %v380_v39 = vld [vmem:[%s2955_s1 + $0xb0] sm:$0xff] }
  0x25   : > { %1686 = vmatprep.subr.bf16.mxu1 %v1685_v55  ;;  %v387_v42 = vld [vmem:[%s2955_s1 + $0xe8] sm:$0xff]  ;;  %v385_v43 = vld [vmem:[%s2955_s1 + $0xd8] sm:$0xff]  ;;  %v1699_v45 = vpack.c.bf16 %v378_v33, %v374_v32  ;;  %v1731_v46 = vpack.c.bf16 %v380_v39, %v376_v37  ;;  %v382_v47 = vld [vmem:[%s2955_s1 + $0xc0] sm:$0xff] }
  0x26   : > { %1656 = vmatpush1.bf16.msra.mxu0 %v1655_v60  ;;  %v389_v44 = vld [vmem:[%s2955_s1 + $0xf8] sm:$0xff]  ;;  %v386_v48 = vld [vmem:[%s2955_s1 + $0xe0] sm:$0xff]  ;;  %v1701_v49 = vpack.c.bf16 %v387_v42, %v383_v41  ;;  %v384_v51 = vld [vmem:[%s2955_s1 + $0xd0] sm:$0xff] }
  0x27   : > { %1688 = vmatpush1.bf16.msra.mxu1 %v1687_v61  ;;  %1690 = vmatprep.subr.bf16.mxu0 %v1689_v62  ;;  %v1733_v50 = vpack.c.bf16 %v389_v44, %v385_v43  ;;  %v388_v52 = vld [vmem:[%s2955_s1 + $0xf0] sm:$0xff]  ;;  %v391_v53 = vld [vmem:[%s2955_s1 + $0x108] sm:$0xff]  ;;  %v393_v55 = vld [vmem:[%s2955_s1 + $0x118] sm:$0xff]  ;;  %v1703_v57 = vpack.c.bf16 %v386_v48, %v382_v47 }
  0x28   : > { %1722 = vmatprep.subr.bf16.mxu1 %v1721_v63  ;;  %v395_v54 = vld [vmem:[%s2955_s1 + $0x128] sm:$0xff]  ;;  %v397_v56 = vld [vmem:[%s2955_s1 + $0x138] sm:$0xff]  ;;  %v1735_v58 = vpack.c.bf16 %v388_v52, %v384_v51  ;;  %v390_v59 = vld [vmem:[%s2955_s1 + $0x100] sm:$0xff] }
  0x29   : > { %v394_v60 = vld [vmem:[%s2955_s1 + $0x120] sm:$0xff]  ;;  %v1705_v61 = vpack.c.bf16 %v395_v54, %v391_v53  ;;  %v1737_v62 = vpack.c.bf16 %v397_v56, %v393_v55  ;;  %v392_v63 = vld [vmem:[%s2955_s1 + $0x110] sm:$0xff]  ;;  %v399_v2 = vld [vmem:[%s2955_s1 + $0x148] sm:$0xff] }
  0x2a   : > { %v403_v3 = vld [vmem:[%s2955_s1 + $0x168] sm:$0xff]  ;;  %v405_v5 = vld [vmem:[%s2955_s1 + $0x178] sm:$0xff]  ;;  %v1707_v6 = vpack.c.bf16 %v394_v60, %v390_v59  ;;  %v398_v9 = vld [vmem:[%s2955_s1 + $0x140] sm:$0xff] }
  0x2b   : > { %v402_v10 = vld [vmem:[%s2955_s1 + $0x160] sm:$0xff]  ;;  %v1709_v11 = vpack.c.bf16 %v403_v3, %v399_v2  ;;  %v407_v15 = vld [vmem:[%s2955_s1 + $0x188] sm:$0xff]  ;;  %v408_v25 = vld [vmem:[%s2955_s1 + $0x190] sm:$0xff] }
  0x2c   : > { %v411_v16 = vld [vmem:[%s2955_s1 + $0x1a8] sm:$0xff]  ;;  %v406_v21 = vld [vmem:[%s2955_s1 + $0x180] sm:$0xff]  ;;  %v412_v26 = vld [vmem:[%s2955_s1 + $0x1b0] sm:$0xff] }
  0x2d   : > { %v410_v22 = vld [vmem:[%s2955_s1 + $0x1a0] sm:$0xff]  ;;  %v1713_v23 = vpack.c.bf16 %v411_v16, %v407_v15  ;;  %v421_v32 = vld [vmem:[%s2955_s1 + $0x1f8] sm:$0xff]  ;;  %v416_v42 = vld [vmem:[%s2955_s1 + $0x1d0] sm:$0xff] }
  0x2e   : > { %v1715_v33 = vpack.c.bf16 %v410_v22, %v406_v21  ;;  %v418_v37 = vld [vmem:[%s2955_s1 + $0x1e0] sm:$0xff]  ;;  %v420_v43 = vld [vmem:[%s2955_s1 + $0x1f0] sm:$0xff]  ;;  %v795_v44 = vld [vmem:[%s2957_s3 + $0x8] sm:$0xff] }
  0x2f   : > { %v801_v47 = vld [vmem:[%s2957_s3 + $0x38] sm:$0xff]  ;;  %v798_v51 = vld [vmem:[%s2957_s3 + $0x20] sm:$0xff]  ;;  %v796_v54 = vld [vmem:[%s2957_s3 + $0x10] sm:$0xff] }
  0x30   : > { %v800_v55 = vld [vmem:[%s2957_s3 + $0x30] sm:$0xff]  ;;  %v803_v56 = vld [vmem:[%s2957_s3 + $0x48] sm:$0xff]  ;;  %v809_v59 = vld [vmem:[%s2957_s3 + $0x78] sm:$0xff] }
  0x31   : > { %v804_v3 = vld [vmem:[%s2957_s3 + $0x50] sm:$0xff] }
  0x32   : > { %v816_v16 = vld [vmem:[%s2957_s3 + $0xb0] sm:$0xff] }
  0x8a   : > { %v327_v1 = vpop.permute.xlu0 %326  ;;  %v329_v4 = vpop.permute.xlu1 %328 }
  0x8e   : > { %v331_v12 = vpop.permute.xlu0 %330  ;;  %v333_v17 = vpop.permute.xlu1 %332 }
  0x8f   : > { %v334_v18 = vsub.f32 %v327_v1, %v331_v12  ;;  %v335_v29 = vsub.f32 %v329_v4, %v333_v17  ;;  %v396_v1 = vld [vmem:[%s2955_s1 + $0x130] sm:$0xff]  ;;  %v401_v4 = vld [vmem:[%s2955_s1 + $0x158] sm:$0xff] }
  0x90   : > { %v1739_v7 = vpack.c.bf16 %v396_v1, %v392_v63  ;;  %v1741_v12 = vpack.c.bf16 %v405_v5, %v401_v4  ;;  %v409_v17 = vld [vmem:[%s2955_s1 + $0x198] sm:$0xff]  ;;  %v806_v63 = vld [vmem:[%s2957_s3 + $0x60] sm:$0xff]  ;;  %v808_v4 = vld [vmem:[%s2957_s3 + $0x70] sm:$0xff] }
  0x91   : > { %551 = vmatmul.mubr.f32.vlgmr.msra.gmra.mrb[0].mxu0 %v334_v18  ;;  %628 = vmatmul.mubr.f32.vlgmr.msra.gmra.mrb[0].mxu1 %v334_v18  ;;  %v413_v18 = vld [vmem:[%s2955_s1 + $0x1b8] sm:$0xff]  ;;  %v811_v5 = vld [vmem:[%s2957_s3 + $0x88] sm:$0xff] }
  0x92   : > { %1692 = vmatpush1.bf16.msra.mxu0 %v1691_v13  ;;  %1724 = vmatpush1.bf16.msra.mxu1 %v1723_v14  ;;  %v400_v13 = vld [vmem:[%s2955_s1 + $0x150] sm:$0xff]  ;;  %v1745_v24 = vpack.c.bf16 %v413_v18, %v409_v17  ;;  %v819_v17 = vld [vmem:[%s2957_s3 + $0xc8] sm:$0xff] }
  0x93   : > { %1694 = vmatprep.subr.bf16.mxu0 %v1693_v19  ;;  %1726 = vmatprep.subr.bf16.mxu1 %v1725_v20  ;;  %v404_v14 = vld [vmem:[%s2955_s1 + $0x170] sm:$0xff]  ;;  %v1711_v19 = vpack.c.bf16 %v402_v10, %v398_v9  ;;  %v817_v9 = vld [vmem:[%s2957_s3 + $0xb8] sm:$0xff]  ;;  %v823_v18 = vld [vmem:[%s2957_s3 + $0xe8] sm:$0xff] }
  0x94   : > { %556 = vmatprep.mubr.f32.mxu0 %v1951_v38  ;;  %633 = vmatprep.mubr.f32.mxu1 %v1951_v38  ;;  %v1743_v20 = vpack.c.bf16 %v404_v14, %v400_v13  ;;  %v814_v13 = vld [vmem:[%s2957_s3 + $0xa0] sm:$0xff] }
  0x95   : > { %557 = vmatmul.mubr.f32.gmra.mrb[2].mxu0 %v335_v29  ;;  %634 = vmatmul.mubr.f32.gmra.mrb[2].mxu1 %v335_v29  ;;  %v415_v29 = vld [vmem:[%s2955_s1 + $0x1c8] sm:$0xff] }
  0x96   : > { %1696 = vmatpush1.bf16.msra.mxu0 %v1695_v30  ;;  %1728 = vmatpush1.bf16.msra.mxu1 %v1727_v31  ;;  %v419_v30 = vld [vmem:[%s2955_s1 + $0x1e8] sm:$0xff]  ;;  %v417_v31 = vld [vmem:[%s2955_s1 + $0x1d8] sm:$0xff] }
  0x97   : > { %1698 = vmatprep.subr.bf16.mxu0 %v1697_v35  ;;  %1730 = vmatprep.subr.bf16.mxu1 %v1729_v36  ;;  %v1747_v35 = vpack.c.bf16 %v412_v26, %v408_v25  ;;  %v414_v36 = vld [vmem:[%s2955_s1 + $0x1c0] sm:$0xff]  ;;  %v1717_v39 = vpack.c.bf16 %v419_v30, %v415_v29  ;;  %v1749_v41 = vpack.c.bf16 %v421_v32, %v417_v31  ;;  %v824_v29 = vld [vmem:[%s2957_s3 + $0xf0] sm:$0xff]  ;;  %v827_v30 = vld [vmem:[%s2957_s3 + $0x108] sm:$0xff] }
  0x98   : > { %704 = vmatprep.mubr.f32.mxu0 %v1951_v38  ;;  %781 = vmatprep.mubr.f32.mxu1 %v1951_v38  ;;  %v1719_v48 = vpack.c.bf16 %v418_v37, %v414_v36  ;;  %v1765_v25 = vpack.c.bf16 %v823_v18, %v819_v17  ;;  %v831_v31 = vld [vmem:[%s2957_s3 + $0x128] sm:$0xff]  ;;  %v829_v32 = vld [vmem:[%s2957_s3 + $0x118] sm:$0xff]  ;;  %v826_v37 = vld [vmem:[%s2957_s3 + $0x100] sm:$0xff] }
  0x99   : > { %v850_v18 = vld [vmem:[%s2957_s3 + $0x1c0] sm:$0xff] }
  0x9a   : > { %1700 = vmatpush1.bf16.msra.mxu0 %v1699_v45  ;;  %1732 = vmatpush1.bf16.msra.mxu1 %v1731_v46  ;;  %v799_v45 = vld [vmem:[%s2957_s3 + $0x28] sm:$0xff]  ;;  %v797_v46 = vld [vmem:[%s2957_s3 + $0x18] sm:$0xff] }
  0x9b   : > { %1702 = vmatprep.subr.bf16.mxu0 %v1701_v49  ;;  %1734 = vmatprep.subr.bf16.mxu1 %v1733_v50  ;;  %v1751_v49 = vpack.c.bf16 %v420_v43, %v416_v42  ;;  %v794_v50 = vld [vmem:[%s2957_s3] sm:$0xff]  ;;  %v1753_v52 = vpack.c.bf16 %v799_v45, %v795_v44  ;;  %v1785_v53 = vpack.c.bf16 %v801_v47, %v797_v46  ;;  %v828_v43 = vld [vmem:[%s2957_s3 + $0x110] sm:$0xff]  ;;  %v337_v45 = vpop.permute.xlu0 %336  ;;  %v339_v46 = vpop.permute.xlu1 %338  ;;  %v835_v47 = vld [vmem:[%s2957_s3 + $0x148] sm:$0xff] }
  0x9c   : > { %v1755_v60 = vpack.c.bf16 %v798_v51, %v794_v50  ;;  %v832_v44 = vld [vmem:[%s2957_s3 + $0x130] sm:$0xff]  ;;  %v841_v50 = vld [vmem:[%s2957_s3 + $0x178] sm:$0xff] }
  0x9e   : > { %1704 = vmatpush1.bf16.msra.mxu0 %v1703_v57  ;;  %1736 = vmatpush1.bf16.msra.mxu1 %v1735_v58  ;;  %v807_v57 = vld [vmem:[%s2957_s3 + $0x68] sm:$0xff]  ;;  %v805_v58 = vld [vmem:[%s2957_s3 + $0x58] sm:$0xff] }
  0x9f   : > { %1706 = vmatprep.subr.bf16.mxu0 %v1705_v61  ;;  %1738 = vmatprep.subr.bf16.mxu1 %v1737_v62  ;;  %v1787_v61 = vpack.c.bf16 %v800_v55, %v796_v54  ;;  %v802_v62 = vld [vmem:[%s2957_s3 + $0x40] sm:$0xff]  ;;  %v1757_v1 = vpack.c.bf16 %v807_v57, %v803_v56  ;;  %v1789_v2 = vpack.c.bf16 %v809_v59, %v805_v58  ;;  %v836_v57 = vld [vmem:[%s2957_s3 + $0x150] sm:$0xff]  ;;  %v843_v59 = vld [vmem:[%s2957_s3 + $0x188] sm:$0xff] }
  0xa0   : > { %v1759_v10 = vpack.c.bf16 %v806_v63, %v802_v62  ;;  %v838_v54 = vld [vmem:[%s2957_s3 + $0x160] sm:$0xff]  ;;  %v840_v58 = vld [vmem:[%s2957_s3 + $0x170] sm:$0xff]  ;;  %v847_v62 = vld [vmem:[%s2957_s3 + $0x1a8] sm:$0xff] }
  0xa1   : > { %v845_v63 = vld [vmem:[%s2957_s3 + $0x198] sm:$0xff] }
  0xa2   : > { %1708 = vmatpush1.bf16.msra.mxu0 %v1707_v6  ;;  %1740 = vmatpush1.bf16.msra.mxu1 %v1739_v7  ;;  %v815_v6 = vld [vmem:[%s2957_s3 + $0xa8] sm:$0xff]  ;;  %v813_v7 = vld [vmem:[%s2957_s3 + $0x98] sm:$0xff] }
  0xa3   : > { %1710 = vmatprep.subr.bf16.mxu0 %v1709_v11  ;;  %1742 = vmatprep.subr.bf16.mxu1 %v1741_v12  ;;  %v1791_v11 = vpack.c.bf16 %v808_v4, %v804_v3  ;;  %v810_v12 = vld [vmem:[%s2957_s3 + $0x80] sm:$0xff]  ;;  %v1761_v14 = vpack.c.bf16 %v815_v6, %v811_v5  ;;  %v1793_v15 = vpack.c.bf16 %v817_v9, %v813_v7  ;;  %v345_v3 = vpop.permute.xlu1 %344  ;;  %v844_v9 = vld [vmem:[%s2957_s3 + $0x190] sm:$0xff] }
  0xa4   : > { %v1763_v21 = vpack.c.bf16 %v814_v13, %v810_v12  ;;  %v846_v5 = vld [vmem:[%s2957_s3 + $0x1a0] sm:$0xff]  ;;  %v1777_v6 = vpack.c.bf16 %v847_v62, %v843_v59  ;;  %v1092_v59 = vld [vmem:[%s2959_s5 + $0x110] sm:$0xff]  ;;  %v1079_v62 = vld [vmem:[%s2959_s5 + $0xa8] sm:$0xff] }
  0xa6   : > { %1712 = vmatpush1.bf16.msra.mxu0 %v1711_v19  ;;  %1744 = vmatpush1.bf16.msra.mxu1 %v1743_v20  ;;  %v821_v19 = vld [vmem:[%s2957_s3 + $0xd8] sm:$0xff] }
  0xa7   : > { %1714 = vmatprep.subr.bf16.mxu0 %v1713_v23  ;;  %1746 = vmatprep.subr.bf16.mxu1 %v1745_v24  ;;  %v825_v20 = vld [vmem:[%s2957_s3 + $0xf8] sm:$0xff]  ;;  %v818_v23 = vld [vmem:[%s2957_s3 + $0xc0] sm:$0xff] }
  0xa8   : > { %v822_v24 = vld [vmem:[%s2957_s3 + $0xe0] sm:$0xff]  ;;  %v1797_v26 = vpack.c.bf16 %v825_v20, %v821_v19  ;;  %v852_v20 = vld [vmem:[%s2957_s3 + $0x1d0] sm:$0xff] }
  0xa9   : > { %v854_v19 = vld [vmem:[%s2957_s3 + $0x1e0] sm:$0xff] }
  0xaa   : > { %1716 = vmatpush1.bf16.msra.mxu0 %v1715_v33  ;;  %1748 = vmatpush1.bf16.msra.mxu1 %v1747_v35  ;;  %v833_v33 = vld [vmem:[%s2957_s3 + $0x138] sm:$0xff]  ;;  %v1767_v35 = vpack.c.bf16 %v822_v24, %v818_v23  ;;  %v856_v23 = vld [vmem:[%s2957_s3 + $0x1f0] sm:$0xff]  ;;  %v1074_v24 = vld [vmem:[%s2959_s5 + $0x80] sm:$0xff] }
  0xab   : > { %1718 = vmatprep.subr.bf16.mxu0 %v1717_v39  ;;  %1750 = vmatprep.subr.bf16.mxu1 %v1749_v41  ;;  %v830_v39 = vld [vmem:[%s2957_s3 + $0x120] sm:$0xff]  ;;  %v1769_v41 = vpack.c.bf16 %v831_v31, %v827_v30  ;;  %v1801_v42 = vpack.c.bf16 %v833_v33, %v829_v32  ;;  %v1107_v32 = vld [vmem:[%s2959_s5 + $0x188] sm:$0xff]  ;;  %v1783_v33 = vpack.c.bf16 %v854_v19, %v850_v18  ;;  %v1096_v18 = vld [vmem:[%s2959_s5 + $0x130] sm:$0xff] }
  0xac   : > { %v1771_v51 = vpack.c.bf16 %v830_v39, %v826_v37  ;;  %v1106_v31 = vld [vmem:[%s2959_s5 + $0x180] sm:$0xff]  ;;  %v1097_v19 = vld [vmem:[%s2959_s5 + $0x138] sm:$0xff] }
  0xad   : > { %v1849_v37 = vpack.c.bf16 %v1107_v32, %v1106_v31  ;;  %v1058_v39 = vld [vmem:[%s2959_s5] sm:$0xff]  ;;  %v1099_v32 = vld [vmem:[%s2959_s5 + $0x148] sm:$0xff] }
  0xae   : > { %1720 = vmatpush1.bf16.msra.mxu0 %v1719_v48  ;;  %1752 = vmatpush1.bf16.msra.mxu1 %v1751_v49  ;;  %v839_v48 = vld [vmem:[%s2957_s3 + $0x168] sm:$0xff]  ;;  %v837_v49 = vld [vmem:[%s2957_s3 + $0x158] sm:$0xff]  ;;  %v1098_v31 = vld [vmem:[%s2959_s5 + $0x140] sm:$0xff] }
  0xaf   : > { %1754 = vmatprep.subr.bf16.mxu0 %v1753_v52  ;;  %1786 = vmatprep.subr.bf16.mxu1 %v1785_v53  ;;  %v1803_v52 = vpack.c.bf16 %v832_v44, %v828_v43  ;;  %v834_v53 = vld [vmem:[%s2957_s3 + $0x140] sm:$0xff]  ;;  %v1773_v55 = vpack.c.bf16 %v839_v48, %v835_v47  ;;  %v1805_v56 = vpack.c.bf16 %v841_v50, %v837_v49  ;;  %v1077_v47 = vld [vmem:[%s2959_s5 + $0x98] sm:$0xff]  ;;  %v1108_v48 = vld [vmem:[%s2959_s5 + $0x190] sm:$0xff] }
  0xb0   : > { %v1775_v4 = vpack.c.bf16 %v838_v54, %v834_v53  ;;  %v1090_v44 = vld [vmem:[%s2959_s5 + $0x100] sm:$0xff]  ;;  %v1109_v49 = vld [vmem:[%s2959_s5 + $0x198] sm:$0xff]  ;;  %v1060_v53 = vld [vmem:[%s2959_s5 + $0x10] sm:$0xff] }
  0xb1   : > { %705 = vmatmul.mubr.f32.vlgmr.msra.gmra.mrb[0].mxu0 %v2076_v27  ;;  %782 = vmatmul.mubr.f32.vlgmr.msra.gmra.mrb[0].mxu1 %v2076_v27  ;;  %v812_v27 = vld [vmem:[%s2957_s3 + $0x90] sm:$0xff]  ;;  %v1061_v54 = vld [vmem:[%s2959_s5 + $0x18] sm:$0xff] }
  0xb2   : > { %1756 = vmatpush1.bf16.msra.mxu0 %v1755_v60  ;;  %1788 = vmatpush1.bf16.msra.mxu1 %v1787_v61  ;;  %v1795_v22 = vpack.c.bf16 %v816_v16, %v812_v27  ;;  %v340_v60 = vadd.f32 %v337_v45, %v2089_v34  ;;  %v341_v61 = vadd.f32 %v339_v46, %v2102_v40  ;;  %v842_v40 = vld [vmem:[%s2957_s3 + $0x180] sm:$0xff]  ;;  %v857_v27 = vld [vmem:[%s2957_s3 + $0x1f8] sm:$0xff]  ;;  %v1091_v45 = vld [vmem:[%s2959_s5 + $0x108] sm:$0xff] }
  0xb3   : > { %1758 = vmatprep.subr.bf16.mxu0 %v1757_v1  ;;  %1790 = vmatprep.subr.bf16.mxu1 %v1789_v2  ;;  %v849_v1 = vld [vmem:[%s2957_s3 + $0x1b8] sm:$0xff]  ;;  %v343_v2 = vpop.permute.xlu0 %342  ;;  %v1807_v34 = vpack.c.bf16 %v840_v58, %v836_v57  ;;  %v1779_v16 = vpack.c.bf16 %v846_v5, %v842_v40  ;;  %v1076_v46 = vld [vmem:[%s2959_s5 + $0x90] sm:$0xff]  ;;  %v1853_v58 = vpack.c.bf16 %v1109_v49, %v1108_v48  ;;  %v1063_v40 = vld [vmem:[%s2959_s5 + $0x28] sm:$0xff] }
  0xb4   : > { %710 = vmatprep.mubr.f32.mxu0 %v1951_v38  ;;  %787 = vmatprep.mubr.f32.mxu1 %v1951_v38  ;;  %v1809_v7 = vpack.c.bf16 %v849_v1, %v845_v63  ;;  %v346_v12 = vadd.f32 %v343_v2, %v340_v60  ;;  %v347_v13 = vadd.f32 %v345_v3, %v341_v61  ;;  %v1093_v60 = vld [vmem:[%s2959_s5 + $0x118] sm:$0xff]  ;;  %v1078_v61 = vld [vmem:[%s2959_s5 + $0xa0] sm:$0xff]  ;;  %v1111_v1 = vld [vmem:[%s2959_s5 + $0x1a8] sm:$0xff] }
  0xb5   : > { %711 = vmatmul.mubr.f32.gmra.mrb[2].mxu0 %v2079_v28  ;;  %788 = vmatmul.mubr.f32.gmra.mrb[2].mxu1 %v2079_v28  ;;  %v820_v28 = vld [vmem:[%s2957_s3 + $0xd0] sm:$0xff]  ;;  %v1821_v57 = vpack.c.bf16 %v1077_v47, %v1076_v46  ;;  %v1110_v63 = vld [vmem:[%s2959_s5 + $0x1a0] sm:$0xff]  ;;  %v1823_v3 = vpack.c.bf16 %v1061_v54, %v1060_v53  ;;  %v1825_v5 = vpack.c.bf16 %v1079_v62, %v1078_v61  ;;  %v1101_v47 = vld [vmem:[%s2959_s5 + $0x158] sm:$0xff] }
  0xb6   : > { %1760 = vmatpush1.bf16.msra.mxu0 %v1759_v10  ;;  %1792 = vmatpush1.bf16.msra.mxu1 %v1791_v11  ;;  %v1799_v36 = vpack.c.bf16 %v824_v29, %v820_v28  ;;  %v848_v10 = vld [vmem:[%s2957_s3 + $0x1b0] sm:$0xff]  ;;  %v851_v11 = vld [vmem:[%s2957_s3 + $0x1c8] sm:$0xff]  ;;  %v352_v28 = vrot.slane %v346_v12, 1  ;;  %v349_v29 = vrot.slane %v347_v13, 7  ;;  %v353_v30 = vrot.slane %v347_v13, 1  ;;  %v1086_v48 = vld [vmem:[%s2959_s5 + $0xe0] sm:$0xff] }
  0xb7   : > { %1762 = vmatprep.subr.bf16.mxu0 %v1761_v14  ;;  %1794 = vmatprep.subr.bf16.mxu1 %v1793_v15  ;;  %v855_v14 = vld [vmem:[%s2957_s3 + $0x1e8] sm:$0xff]  ;;  %v853_v15 = vld [vmem:[%s2957_s3 + $0x1d8] sm:$0xff]  ;;  %v1811_v17 = vpack.c.bf16 %v848_v10, %v844_v9  ;;  %v1080_v9 = vld [vmem:[%s2959_s5 + $0xb0] sm:$0xff] }
  0xb8   : > { %922 = vmatprep.mubr.f32.mxu0 %v1951_v38  ;;  %999 = vmatprep.mubr.f32.mxu1 %v1951_v38  ;;  %v354_v43 = vsel %vm321_vm1, %v352_v28, %v353_v30  ;;  %v1081_v10 = vld [vmem:[%s2959_s5 + $0xb8] sm:$0xff]  ;;  %v1100_v46 = vld [vmem:[%s2959_s5 + $0x150] sm:$0xff]  ;;  %v1087_v49 = vld [vmem:[%s2959_s5 + $0xe8] sm:$0xff] }
  0xb9   : > { %v1871_v53 = vpack.c.bf16 %v1101_v47, %v1100_v46  ;;  %v1841_v54 = vpack.c.bf16 %v1087_v49, %v1086_v48  ;;  %v1088_v62 = vld [vmem:[%s2959_s5 + $0xf0] sm:$0xff]  ;;  %v1330_v46 = vld [vmem:[%s2961_s7 + $0x8] sm:$0xff]  ;;  %v1332_v49 = vld [vmem:[%s2961_s7 + $0x18] sm:$0xff] }
  0xba   : > { %1764 = vmatpush1.bf16.msra.mxu0 %v1763_v21  ;;  %1796 = vmatpush1.bf16.msra.mxu1 %v1795_v22  ;;  %v1781_v21 = vpack.c.bf16 %v855_v14, %v851_v11  ;;  %v1813_v22 = vpack.c.bf16 %v857_v27, %v853_v15  ;;  %v1112_v11 = vld [vmem:[%s2959_s5 + $0x1b0] sm:$0xff]  ;;  %v1065_v27 = vld [vmem:[%s2959_s5 + $0x38] sm:$0xff] }
  0xbb   : > { %1766 = vmatprep.subr.bf16.mxu0 %v1765_v25  ;;  %1798 = vmatprep.subr.bf16.mxu1 %v1797_v26  ;;  %v1075_v25 = vld [vmem:[%s2959_s5 + $0x88] sm:$0xff]  ;;  %v348_v26 = vrot.slane %v346_v12, 7  ;;  %v1113_v12 = vld [vmem:[%s2959_s5 + $0x1b8] sm:$0xff]  ;;  %v1064_v15 = vld [vmem:[%s2959_s5 + $0x30] sm:$0xff] }
  0xbc   : > { %v1331_v47 = vld [vmem:[%s2961_s7 + $0x10] sm:$0xff] }
  0xbe   : > { %1768 = vmatpush1.bf16.msra.mxu0 %v1767_v35  ;;  %1800 = vmatpush1.bf16.msra.mxu1 %v1799_v36  ;;  %v1815_v35 = vpack.c.bf16 %v856_v23, %v852_v20  ;;  %v1817_v36 = vpack.c.bf16 %v1075_v25, %v1074_v24  ;;  %v1082_v20 = vld [vmem:[%s2959_s5 + $0xc0] sm:$0xff]  ;;  %v1115_v23 = vld [vmem:[%s2959_s5 + $0x1c8] sm:$0xff]  ;;  %v1831_v24 = vpack.c.bf16 %v1065_v27, %v1064_v15 }
  0xbf   : > { %1770 = vmatprep.subr.bf16.mxu0 %v1769_v41  ;;  %1802 = vmatprep.subr.bf16.mxu1 %v1801_v42  ;;  %v1059_v41 = vld [vmem:[%s2959_s5 + $0x8] sm:$0xff]  ;;  %v351_v42 = vsel %vm312_vm0, %v349_v29, %v348_v26  ;;  %v1863_v25 = vpack.c.bf16 %v1097_v19, %v1096_v18 }
  0xc0   : > { %v356_v50 = vsub.f32 %v351_v42, %v354_v43  ;;  %v1068_v42 = vld [vmem:[%s2959_s5 + $0x50] sm:$0xff]  ;;  %v1069_v43 = vld [vmem:[%s2959_s5 + $0x58] sm:$0xff] }
  0xc2   : > { %1772 = vmatpush1.bf16.msra.mxu0 %v1771_v51  ;;  %1804 = vmatpush1.bf16.msra.mxu1 %v1803_v52  ;;  %v1819_v51 = vpack.c.bf16 %v1059_v41, %v1058_v39  ;;  %v1851_v52 = vpack.c.bf16 %v1091_v45, %v1090_v44  ;;  %v1867_v41 = vpack.c.bf16 %v1099_v32, %v1098_v31 }
  0xc3   : > { %1774 = vmatprep.subr.bf16.mxu0 %v1773_v55  ;;  %1806 = vmatprep.subr.bf16.mxu1 %v1805_v56  ;;  %v350_v55 = vsel %vm312_vm0, %v348_v26, %v349_v29  ;;  %v355_v56 = vsel %vm321_vm1, %v353_v30, %v352_v28  ;;  %v1066_v26 = vld [vmem:[%s2959_s5 + $0x40] sm:$0xff]  ;;  %v1067_v28 = vld [vmem:[%s2959_s5 + $0x48] sm:$0xff] }
  0xc4   : > { %v357_v2 = vsub.f32 %v350_v55, %v355_v56  ;;  %v1835_v39 = vpack.c.bf16 %v1067_v28, %v1066_v26  ;;  %v1070_v56 = vld [vmem:[%s2959_s5 + $0x60] sm:$0xff] }
  0xc6   : > { %1776 = vmatpush1.bf16.msra.mxu0 %v1775_v4  ;;  %1808 = vmatpush1.bf16.msra.mxu1 %v1807_v34  ;;  %v1855_v4 = vpack.c.bf16 %v1093_v60, %v1092_v59  ;;  %v1062_v34 = vld [vmem:[%s2959_s5 + $0x20] sm:$0xff]  ;;  %v1103_v60 = vld [vmem:[%s2959_s5 + $0x168] sm:$0xff] }
  0xc7   : > { %1778 = vmatprep.subr.bf16.mxu0 %v1777_v6  ;;  %1810 = vmatprep.subr.bf16.mxu1 %v1809_v7  ;;  %v1857_v6 = vpack.c.bf16 %v1111_v1, %v1110_v63  ;;  %v1095_v7 = vld [vmem:[%s2959_s5 + $0x128] sm:$0xff]  ;;  %v1827_v13 = vpack.c.bf16 %v1063_v40, %v1062_v34  ;;  %v1089_v63 = vld [vmem:[%s2959_s5 + $0xf8] sm:$0xff]  ;;  %v1120_v1 = vld [vmem:[%s2959_s5 + $0x1f0] sm:$0xff] }
  0xc8   : > { %v1073_v34 = vld [vmem:[%s2959_s5 + $0x78] sm:$0xff] }
  0xca   : > { %1780 = vmatpush1.bf16.msra.mxu0 %v1779_v16  ;;  %1812 = vmatpush1.bf16.msra.mxu1 %v1811_v17  ;;  %v1829_v16 = vpack.c.bf16 %v1081_v10, %v1080_v9  ;;  %v1861_v17 = vpack.c.bf16 %v1113_v12, %v1112_v11  ;;  %v1024_v9 = vsub.s32 0, %v2029_v8  ;;  %v1032_v10 = vsub.s32 2, %v2029_v8  ;;  %v1020_v11 = vld [vmem:[%s2958_s4] sm:$0xf] }
  0xcb   : > { %1782 = vmatprep.subr.bf16.mxu0 %v1781_v21  ;;  %1814 = vmatprep.subr.bf16.mxu1 %v1813_v22  ;;  %v1083_v21 = vld [vmem:[%s2959_s5 + $0xc8] sm:$0xff]  ;;  %v1114_v22 = vld [vmem:[%s2959_s5 + $0x1c0] sm:$0xff]  ;;  %v1028_v12 = vsub.s32 1, %v2029_v8 }
  0xcc   : > { %v1833_v29 = vpack.c.bf16 %v1083_v21, %v1082_v20  ;;  %v1865_v30 = vpack.c.bf16 %v1115_v23, %v1114_v22  ;;  %v1033_v15 = vrot.slane %v1020_v11, %v1032_v10 }
  0xcd   : > { %v1029_v27 = vrot.slane %v1020_v11, %v1028_v12  ;;  %v1340_v12 = vld [vmem:[%s2961_s7 + $0x58] sm:$0xff] }
  0xce   : > { %1784 = vmatpush1.bf16.msra.mxu0 %v1783_v33  ;;  %1816 = vmatpush1.bf16.msra.mxu1 %v1815_v35  ;;  %v1084_v33 = vld [vmem:[%s2959_s5 + $0xd0] sm:$0xff]  ;;  %v1085_v35 = vld [vmem:[%s2959_s5 + $0xd8] sm:$0xff] }
  0xcf   : > { %1818 = vmatprep.subr.bf16.mxu0 %v1817_v36  ;;  %1850 = vmatprep.subr.bf16.mxu1 %v1849_v37  ;;  %v1116_v36 = vld [vmem:[%s2959_s5 + $0x1d0] sm:$0xff]  ;;  %v1117_v37 = vld [vmem:[%s2959_s5 + $0x1d8] sm:$0xff]  ;;  %v1837_v44 = vpack.c.bf16 %v1085_v35, %v1084_v33 }
  0xd0   : > { %v1869_v45 = vpack.c.bf16 %v1117_v37, %v1116_v36 }
  0xd1   : > { %923 = vmatmul.mubr.f32.vlgmr.msra.gmra.mrb[0].mxu0 %v356_v50  ;;  %1000 = vmatmul.mubr.f32.vlgmr.msra.gmra.mrb[0].mxu1 %v356_v50  ;;  %v1118_v50 = vld [vmem:[%s2959_s5 + $0x1e0] sm:$0xff] }
  0xd2   : > { %928 = vmatprep.mubr.f32.mxu0 %v1951_v38  ;;  %1005 = vmatprep.mubr.f32.mxu1 %v1951_v38  ;;  %v1094_v38 = vld [vmem:[%s2959_s5 + $0x120] sm:$0xff] }
  0xd3   : > { %1820 = vmatpush3.bf16.msra.mxu0 %v1819_v51  ;;  %1852 = vmatpush3.bf16.msra.mxu1 %v1851_v52  ;;  %v1859_v14 = vpack.c.bf16 %v1095_v7, %v1094_v38  ;;  %v1119_v51 = vld [vmem:[%s2959_s5 + $0x1e8] sm:$0xff]  ;;  %v1839_v52 = vpack.c.bf16 %v1069_v43, %v1068_v42  ;;  %v1105_v38 = vld [vmem:[%s2959_s5 + $0x178] sm:$0xff] }
  0xd4   : > { %1822 = vmatprep.subr.bf16.mxu0 %v1821_v57  ;;  %1854 = vmatprep.subr.bf16.mxu1 %v1853_v58  ;;  %v1873_v55 = vpack.c.bf16 %v1119_v51, %v1118_v50  ;;  %v1071_v57 = vld [vmem:[%s2959_s5 + $0x68] sm:$0xff]  ;;  %v1102_v58 = vld [vmem:[%s2959_s5 + $0x160] sm:$0xff]  ;;  %v1885_v50 = vpack.c.bf16 %v1332_v49, %v1331_v47 }
  0xd5   : > { %929 = vmatmul.mubr.f32.gmra.mrb[2].mxu0 %v357_v2  ;;  %1006 = vmatmul.mubr.f32.gmra.mrb[2].mxu1 %v357_v2  ;;  %v1843_v59 = vpack.c.bf16 %v1071_v57, %v1070_v56  ;;  %v1875_v61 = vpack.c.bf16 %v1103_v60, %v1102_v58  ;;  %v1845_v2 = vpack.c.bf16 %v1089_v63, %v1088_v62  ;;  %v1333_v51 = vld [vmem:[%s2961_s7 + $0x20] sm:$0xff]  ;;  %v2887_v56 = vand.u32 127, %v310_v0 }
  0xd6   : > { %v1272_v0 = vld [vmem:[%s2960_s6] sm:$0xff] }
  0xd7   : > { %1824 = vmatpush3.bf16.msra.mxu0 %v1823_v3  ;;  %1856 = vmatpush3.bf16.msra.mxu1 %v1855_v4  ;;  %v1121_v3 = vld [vmem:[%s2959_s5 + $0x1f8] sm:$0xff]  ;;  %v1072_v4 = vld [vmem:[%s2959_s5 + $0x70] sm:$0xff]  ;;  %vm1285_vm3 = vcmp.ge.s32.totalorder %v2887_v56, 8  ;;  %vm1292_vm4 = vcmp.lt.s32.totalorder %v2887_v56, 120 }
  0xd8   : > { %1826 = vmatprep.subr.bf16.mxu0 %v1825_v5  ;;  %1858 = vmatprep.subr.bf16.mxu1 %v1857_v6  ;;  %v1877_v40 = vpack.c.bf16 %v1121_v3, %v1120_v1  ;;  %v1847_v5 = vpack.c.bf16 %v1073_v34, %v1072_v4  ;;  %v1104_v6 = vld [vmem:[%s2959_s5 + $0x170] sm:$0xff]  ;;  %v1337_v1 = vld [vmem:[%s2961_s7 + $0x40] sm:$0xff]  ;;  %v1281_v3 = vand.u32 7, %v2887_v56 }
  0xd9   : > { %v1879_v7 = vpack.c.bf16 %v1105_v38, %v1104_v6 }
  0xda   : > { %vm2908_vm2 = vcmp.eq.s32.totalorder %v1281_v3, 3 }
  0xdb   : > { %1828 = vmatpush3.bf16.msra.mxu0 %v1827_v13  ;;  %1860 = vmatpush3.bf16.msra.mxu1 %v1859_v14  ;;  %v1036_v13 = vsub.s32 3, %v2029_v8  ;;  %v1025_v14 = vrot.slane %v1020_v11, %v1024_v9 }
  0xdc   : > { %1830 = vmatprep.subr.bf16.mxu0 %v1829_v16  ;;  %1862 = vmatprep.subr.bf16.mxu1 %v1861_v17 }
  0xdd   : > { %v1037_v16 = vrot.slane %v1020_v11, %v1036_v13  ;;  %v1339_v11 = vld [vmem:[%s2961_s7 + $0x50] sm:$0xff]  ;;  %v1273_v13 = vld [vmem:[%s2960_s6 + $0x8] sm:$0xff] }
  0xdf   : > { %1832 = vmatpush3.bf16.msra.mxu0 %v1831_v24  ;;  %1864 = vmatpush3.bf16.msra.mxu1 %v1863_v25 }
  0xe0   : > { %1834 = vmatprep.subr.bf16.mxu0 %v1833_v29  ;;  %1866 = vmatprep.subr.bf16.mxu1 %v1865_v30 }
  0xe3   : > { %1836 = vmatpush3.bf16.msra.mxu0 %v1835_v39  ;;  %1868 = vmatpush3.bf16.msra.mxu1 %v1867_v41 }
  0xe4   : > { %1838 = vmatprep.subr.bf16.mxu0 %v1837_v44  ;;  %1870 = vmatprep.subr.bf16.mxu1 %v1869_v45  ;;  %v1329_v45 = vld [vmem:[%s2961_s7] sm:$0xff] }
  0xe5   : > { %v1881_v48 = vpack.c.bf16 %v1330_v46, %v1329_v45 }
  0xe7   : > { %1840 = vmatpush3.bf16.msra.mxu0 %v1839_v52  ;;  %1872 = vmatpush3.bf16.msra.mxu1 %v1871_v53  ;;  %v1334_v52 = vld [vmem:[%s2961_s7 + $0x28] sm:$0xff] }
  0xe8   : > { %1842 = vmatprep.subr.bf16.mxu0 %v1841_v54  ;;  %1874 = vmatprep.subr.bf16.mxu1 %v1873_v55  ;;  %v1889_v53 = vpack.c.bf16 %v1334_v52, %v1333_v51  ;;  %v1335_v54 = vld [vmem:[%s2961_s7 + $0x30] sm:$0xff]  ;;  %v1336_v55 = vld [vmem:[%s2961_s7 + $0x38] sm:$0xff] }
  0xe9   : > { %v1893_v57 = vpack.c.bf16 %v1336_v55, %v1335_v54 }
  0xeb   : > { %1844 = vmatpush3.bf16.msra.mxu0 %v1843_v59  ;;  %1876 = vmatpush3.bf16.msra.mxu1 %v1875_v61 }
  0xec   : > { %1846 = vmatprep.subr.bf16.mxu0 %v1845_v2  ;;  %1878 = vmatprep.subr.bf16.mxu1 %v1877_v40  ;;  %v1338_v2 = vld [vmem:[%s2961_s7 + $0x48] sm:$0xff] }
  0xed   : > { %v1897_v4 = vpack.c.bf16 %v1338_v2, %v1337_v1 }
  0xef   : > { %1848 = vmatpush3.bf16.msra.mxu0 %v1847_v5  ;;  %1880 = vmatpush3.bf16.msra.mxu1 %v1879_v7 }
  0xf0   : > { %1882 = vmatprep.subr.bf16.mxu0 %v1881_v48 }
 0x1a4   : > { %v924_v17 = vpop.f32.mrb[0].mxu0  ;;  %v1001_v18 = vpop.f32.mrb[0].mxu1 }
 0x1a5   : > { %v1042_v19 = vadd.f32 %v1025_v14, %v924_v17  ;;  %v1044_v20 = vadd.f32 %v1033_v15, %v1001_v18  ;;  %v926_v21 = vpop.f32.mrb[1].mxu0  ;;  %v1003_v22 = vpop.f32.mrb[1].mxu1 }
 0x1a6   : > { %v1043_v23 = vadd.f32 %v1029_v27, %v926_v21  ;;  %v1045_v24 = vadd.f32 %v1037_v16, %v1003_v22  ;;  %v1342_v21 = vld [vmem:[%s2961_s7 + $0x68] sm:$0xff] }
 0x1a7   : > { %v1050_v30 = vmax.f32 %v1042_v19, 0.0  ;;  %v1052_v31 = vmax.f32 %v1044_v20, 0.0  ;;  %v1341_v20 = vld [vmem:[%s2961_s7 + $0x60] sm:$0xff] }
 0x1a8   : > { %v1051_v25 = vmax.f32 %v1043_v23, 0.0  ;;  %v1053_v26 = vmax.f32 %v1045_v24, 0.0  ;;  %v930_v28 = vpop.f32.mrb[2].mxu0  ;;  %v1007_v29 = vpop.f32.mrb[2].mxu1  ;;  %v1905_v22 = vpack.c.bf16 %v1342_v21, %v1341_v20  ;;  %v1942_v23 = vld [vmem:[%s2064_s20 + $0x8] sm:$0xff] }
 0x1a9   : > { %v1046_v32 = vadd.f32 %v1025_v14, %v930_v28  ;;  %v1048_v33 = vadd.f32 %v1033_v15, %v1007_v29  ;;  %v932_v35 = vpop.f32.mrb[3].mxu0  ;;  %v1009_v36 = vpop.f32.mrb[3].mxu1  ;;  %v1901_v15 = vpack.c.bf16 %v1340_v12, %v1339_v11  ;;  %v1344_v28 = vld [vmem:[%s2961_s7 + $0x78] sm:$0xff] }
 0x1aa   : > { %v1047_v37 = vadd.f32 %v1029_v27, %v932_v35  ;;  %v1049_v39 = vadd.f32 %v1037_v16, %v1009_v36  ;;  %1186 = vmatprep.mubr.f32.mxu0 %v1051_v25  ;;  %1261 = vmatprep.mubr.f32.mxu1 %v1053_v26  ;;  %v1941_v16 = vld [vmem:[%s2064_s20] sm:$0xff]  ;;  %v1343_v26 = vld [vmem:[%s2961_s7 + $0x70] sm:$0xff] }
 0x1ab   : > { %1187 = vmatmul.mubr.f32.vlgmr.msra.gmra.mrb[4].mxu0 %v1050_v30  ;;  %1262 = vmatmul.mubr.f32.vlgmr.msra.gmra.mrb[4].mxu1 %v1052_v31  ;;  %v1054_v43 = vmax.f32 %v1046_v32, 0.0  ;;  %v1056_v44 = vmax.f32 %v1048_v33, 0.0  ;;  %v1909_v29 = vpack.c.bf16 %v1344_v28, %v1343_v26 }
 0x1ac   : > { %v1055_v41 = vmax.f32 %v1047_v37, 0.0  ;;  %v1057_v42 = vmax.f32 %v1049_v39, 0.0  ;;  %1884 = vmatpush3.bf16.msra.mxu0 %v1881_v48 }
 0x1ad   : > { %1886 = vmatprep.subr.bf16.mxu0 %v1885_v50 }
 0x1ae   : > { %1191 = vmatprep.mubr.f32.mxu0 %v1055_v41  ;;  %1266 = vmatprep.mubr.f32.mxu1 %v1057_v42  ;;  %v1280_v41 = vadd.s32 8, %v2029_v8 }
 0x1af   : > { %1192 = vmatmul.mubr.f32.gmra.mrb[6].mxu0 %v1054_v43  ;;  %1267 = vmatmul.mubr.f32.gmra.mrb[6].mxu1 %v1056_v44 }
 0x1b0   : > { %1888 = vmatpush3.bf16.msra.mxu0 %v1885_v50  ;;  %vm1312_vm5 = vcmp.lt.s32.totalorder %v1280_v41, 15 }
 0x1b1   : > { %1890 = vmatprep.subr.bf16.mxu0 %v1889_v53 }
 0x1b4   : > { %1892 = vmatpush3.bf16.msra.mxu0 %v1889_v53 }
 0x1b5   : > { %1894 = vmatprep.subr.bf16.mxu0 %v1893_v57 }
 0x1b8   : > { %1896 = vmatpush3.bf16.msra.mxu0 %v1893_v57 }
 0x1b9   : > { %1898 = vmatprep.subr.bf16.mxu0 %v1897_v4 }
 0x1bc   : > { %1900 = vmatpush3.bf16.msra.mxu0 %v1897_v4 }
 0x1bd   : > { %1902 = vmatprep.subr.bf16.mxu0 %v1901_v15 }
 0x1c0   : > { %1904 = vmatpush3.bf16.msra.mxu0 %v1901_v15 }
 0x1c1   : > { %1906 = vmatprep.subr.bf16.mxu0 %v1905_v22 }
 0x1c4   : > { %1908 = vmatpush3.bf16.msra.mxu0 %v1905_v22 }
 0x1c5   : > { %1910 = vmatprep.subr.bf16.mxu0 %v1909_v29 }
 0x1c8   : > { %1912 = vmatpush3.bf16.msra.mxu0 %v1909_v29 }
 0x27e   : > { %v1528_v58 = vpop.f32.mrb[4].mxu0  ;;  %v1566_v59 = vpop.f32.mrb[4].mxu1 }
 0x27f   : > { %v1529_v60 = vpop.f32.mrb[5].mxu0  ;;  %v1567_v61 = vpop.f32.mrb[5].mxu1 }
 0x280   : > { %v1530_v62 = vadd.f32 %v1529_v60, %v1528_v58  ;;  %v1568_v63 = vadd.f32 %v1567_v61, %v1566_v59  ;;  %v1954_v60 = vmov 1.0  }
 0x282   : > { %v1264_v34 = vadd.f32 %v1568_v63, %v1530_v62  ;;  %v1531_v40 = vpop.f32.mrb[6].mxu0  ;;  %v1569_v5 = vpop.f32.mrb[6].mxu1 }
 0x283   : > { %v1532_v6 = vpop.f32.mrb[7].mxu0  ;;  %v1570_v38 = vpop.f32.mrb[7].mxu1 }
 0x284   : > { %v1274_v7 = vmul.f32 %v1272_v0, %v1264_v34  ;;  %v1533_v9 = vadd.f32 %v1532_v6, %v1531_v40  ;;  %v1571_v10 = vadd.f32 %v1570_v38, %v1569_v5 }
 0x286   : > { %v1269_v27 = vadd.f32 %v1571_v10, %v1533_v9  ;;  %v1276_v17 = vadd.f32 %v1941_v16, %v1274_v7 }
 0x288   : > { %v1275_v18 = vmul.f32 %v1273_v13, %v1269_v27  ;;  %v1283_v19 = vsel %vm2908_vm2, %v1276_v17, -inf }
 0x289   : > { %1286 = vrot.lane.b32.xlu0 %v1283_v19, %s1953_s16 }
 0x28a   : > { %v1277_v24 = vadd.f32 %v1942_v23, %v1275_v18 }
 0x28c   : > { %v1284_v25 = vsel %vm2908_vm2, %v1277_v24, -inf }
 0x28d   : > { %1293 = vrot.lane.b32.xlu0 %v1283_v19, %s1952_s14  ;;  %1288 = vrot.lane.b32.xlu1 %v1284_v25, %s1953_s16  ;;  %s305_s16 = scalar_lea.vmem %s2962_s8, %s1494_s11 }
 0x291   : > { %1295 = vrot.lane.b32.xlu1 %v1284_v25, %s1952_s14 }
 0x2fb   : > { %v1287_v30 = vpop.permute.xlu0 %1286 }
 0x2fc   : > { %v1290_v33 = vsel %vm1285_vm3, %v1287_v30, -inf }
 0x2ff   : > { %v1294_v31 = vpop.permute.xlu0 %1293  ;;  %v1289_v32 = vpop.permute.xlu1 %1288 }
 0x300   : > { %v1297_v35 = vsel %vm1292_vm4, %v1294_v31, -inf  ;;  %v1291_v39 = vsel %vm1285_vm3, %v1289_v32, -inf }
 0x301   : > { %v1299_v36 = vmax.f32 %v1290_v33, %v1297_v35 }
 0x303   : > { %v1296_v37 = vpop.permute.xlu1 %1295  ;;  %v1301_v43 = vmax.f32 %v1283_v19, %v1299_v36 }
 0x304   : > { %v1298_v42 = vsel %vm1292_vm4, %v1296_v37, -inf }
 0x305   : > { %v1300_v44 = vmax.f32 %v1291_v39, %v1298_v42  ;;  %v1305_v46 = vrot.slane %v1301_v43, 7  ;;  %v1313_v47 = vrot.slane %v1301_v43, 1 }
 0x307   : > { %v1302_v45 = vmax.f32 %v1284_v25, %v1300_v44 }
 0x309   : > { %v1306_v48 = vrot.slane %v1302_v45, 7  ;;  %v1314_v49 = vrot.slane %v1302_v45, 1 }
 0x30b   : > { %v1307_v50 = vsel %vm312_vm0, %v1305_v46, %v1306_v48  ;;  %v1316_v51 = vsel %vm321_vm1, %v1314_v49, %v1313_v47  ;;  %v1308_v52 = vsel %vm312_vm0, %v1306_v48, %v1305_v46  ;;  %v1315_v53 = vsel %vm321_vm1, %v1313_v47, %v1314_v49 }
 0x30c   : > { %v1318_v54 = vsel %vm1312_vm5, %v1316_v51, -inf  ;;  %v1309_v55 = vsel %vm1303_vm6, %v1308_v52, -inf }
 0x30d   : > { %v1320_v56 = vmax.f32 %v1307_v50, %v1318_v54  ;;  %v1319_v57 = vmax.f32 %v1309_v55, %v1315_v53 }
 0x30f   : > { %v1322_v58 = vmax.f32 %v1302_v45, %v1320_v56  ;;  %v1321_v59 = vmax.f32 %v1301_v43, %v1319_v57 }
 0x311   : > { %vm1323_vm7 = vcmp.gt.f32.partialorder %v1321_v59, 0.1  ;;  %vm1324_vm8 = vcmp.gt.f32.partialorder %v1322_v58, 0.1 }
 0x312   : > { %1622 = vmatprep.mubr.msk.f32.mxu0 %vm1323_vm7, %v1954_v60 }
 0x313   : > { %1623 = vmatmul.mubr.msk.f32.vlgmr.msra.gmra.mrb[8].mxu0 %vm1324_vm8, %v1954_v60 }
 0x3e6   : > { %v1624_v61 = vpop.f32.mrb[8].mxu0 }
 0x3e7   : > { %v1421_v62 = vmul.f32 %v1624_v61, %v1277_v24  ;;  %v1411_v8 = vpop.f32.mrb[9].mxu0 }
 0x3e8   : > { %v1420_v63 = vmul.f32 %v1411_v8, %v1276_v17 }
 0x3e9   : > { %1423 = vst [vmem:[%s305_s16 + $0x8] sm:$0xff] %v1421_v62 }
 0x3ea   : > { %1422 = vst [vmem:[%s305_s16] sm:$0xff] %v1420_v63 }
 0x3eb PF: > { %s18_s27 = sadd.s32 1, %s1949_s27  }
 0x3ec   : > { %p15_p4 = scmp.ge.s32.totalorder %s18_s27, 4  }
 0x3ee   :  { %17 = sbr.rel (!%p15_p4) target bundleno = 1 (0x1), region = 82 }

</bundles_post_ra>
